<compile_context>
chip_gen: v6e
topology: v6e:2x2x1
jax: 0.10.0
libtpu: 0.0.40
codegen_flags: <defaults>
</compile_context>

<pallas_src>
import numpy as np
import jax
import jax.numpy as jnp
from jax.experimental import pallas as pl
from jax.experimental.pallas import tpu as pltpu

# ----------------------------- configuration (backbone.Cfg) -----------------------------
USE_BN = True
RESIDUAL_CHANNELS = 8
GATE_CHANNELS = 8
SKIP_CHANNELS = 16
HEAD_CHANNELS = 16
MIXTURE_SIZE = 4

HISTORY_DAYS = 9                      # sequence length
NUM_FEAT = 4                          # numeric feature count
EMB_SIZE = [5, 7]                     # vocab sizes of static categorical features
EMB_SEQ_SIZE = [3]                    # vocab sizes of sequential categorical features
BATCH = 2

BLOCKS = int(np.log2(HISTORY_DAYS - 1)) + 1   # = 4 ; seq 9 -> 5 -> 3 -> 2 -> 1
BN_EPS = 1e-5
STD_EPS = 1e-6
OUT_LANES = 128                       # lane-dense output slab (unmasked vst); payload is 3*M cols


def _sigmoid(x):
    return 1.0 / (1.0 + jnp.exp(-x))


def _softplus(x):
    return jnp.maximum(x, 0.0) + jnp.log(1.0 + jnp.exp(-jnp.abs(x)))


def _round_up(x, m):
    return ((x + m - 1) // m) * m


# ----------------------------- Pallas kernel -----------------------------
def _wave_net_kernel(x_ref, w0_ref, aff_ref, w_sg_ref, w_sr_ref, b_blk_ref,
                     w_end_ref, w_head_ref, b_misc_ref, out_ref):
    """One batch tile of TB samples.

    x_ref:   (L*TB, Cin)     time-major / batch-minor rows, fused feature columns
    out_ref: (TB, OUT_LANES) [logits | loc | scale | zero-pad]
    """
    f32 = jnp.float32
    R, G, S, H, M = (RESIDUAL_CHANNELS, GATE_CHANNELS, SKIP_CHANNELS,
                     HEAD_CHANNELS, MIXTURE_SIZE)
    TB = out_ref.shape[0]
    L = x_ref.shape[0] // TB

    b_misc = b_misc_ref[...]                                  # (1, R+H+3M)
    b0 = b_misc[:, :R]
    b_end = b_misc[:, R:R + H]
    b_head = b_misc[:, R + H:]

    # ---- fused input stage: one (L*TB, Cin) @ (Cin, R) matmul (BN folded into w0) ----
    y = jnp.dot(x_ref[...], w0_ref[...], preferred_element_type=f32) + b0   # (L*TB, R)

    skips = jnp.zeros((TB, S), f32)
    cur_len = L
    for blk in range(BLOCKS):
        aff = aff_ref[blk]                                    # (2, R): [scale; shift]
        z = y * aff[0:1, :] + aff[1:2, :]                     # BN folded to affine

        out_len = (cur_len + 1) // 2
        # left-pad(1) + kernel-2/stride-2 conv taps: padded[2t] (even) and padded[2t+1]
        # (odd), built from sublane-aligned static row-chunk slices (no matmuls/iota).
        zo = jnp.concatenate(
            [z[(2 * t) * TB:(2 * t + 1) * TB, :] for t in range(out_len)], axis=0)
        ze_parts = [jnp.zeros((TB, R), f32)]                  # the zero left-pad row
        ze_parts += [z[(2 * t - 1) * TB:(2 * t) * TB, :] for t in range(1, out_len)]
        ze = jnp.concatenate(ze_parts, axis=0) if len(ze_parts) > 1 else ze_parts[0]
        taps = jnp.concatenate([ze, zo], axis=1)              # (out_len*TB, 2R)

        b_blk = b_blk_ref[blk]                                # (1, 2G + S + R)
        # fused signal+gate conv: one (rows, 2R) @ (2R, 2G) matmul
        pre = jnp.dot(taps, w_sg_ref[blk], preferred_element_type=f32) + b_blk[:, :2 * G]
        gated = jnp.tanh(pre[:, :G]) * _sigmoid(pre[:, G:2 * G])   # (out_len*TB, G)

        # fused skip+residual conv: one (rows, G) @ (G, S+R) matmul
        # (for the last block the final 1x1 skip conv on the residual is already folded
        #  into the skip weight/bias in the wrapper).
        comb = jnp.dot(gated, w_sr_ref[blk], preferred_element_type=f32) + b_blk[:, 2 * G:]
        skips = skips + comb[(out_len - 1) * TB:, :S]         # skip conv on last time step
        y = comb[:, S:]                                       # residual, length halves
        cur_len = out_len

    # ---- head: ReLU -> 1x1 conv -> ReLU -> fused (logits | loc | std) conv ----
    h = jnp.maximum(skips, 0.0)
    h = jnp.maximum(jnp.dot(h, w_end_ref[...], preferred_element_type=f32) + b_end, 0.0)
    raw = jnp.dot(h, w_head_ref[...], preferred_element_type=f32) + b_head   # (TB, 3M)
    scale = _softplus(raw[:, 2 * M:]) + STD_EPS
    # lane-dense (TB, 128) unmasked store: [logits | loc | scale | zeros]
    out_ref[...] = jnp.concatenate(
        [raw[:, :2 * M], scale, jnp.zeros((TB, OUT_LANES - 3 * M), f32)], axis=1)


# ----------------------------- wrapper-side param folding / packing -----------------------------
def _pack_params(p):
    """Fold BN, fuse matmuls and pack params into 8 arrays for the kernel."""
    if USE_BN:
        inv = jax.lax.rsqrt(p["in_rv"] + BN_EPS)              # (1, F)
        s_in = p["in_gamma"] * inv
        c_in = p["in_beta"] - p["in_rm"] * s_in
        w_in_f = p["w_in"] * jnp.transpose(s_in)              # (F, R)
        b0 = p["b_in"] + jnp.dot(c_in, p["w_in"])             # (1, R)
        invb = jax.lax.rsqrt(p["bk_rv"] + BN_EPS)             # (NB, 1, R)
        sc = p["bk_gamma"] * invb
        sh = p["bk_beta"] - p["bk_rm"] * sc
    else:
        w_in_f, b0 = p["w_in"], p["b_in"]
        sc = jnp.ones_like(p["bk_gamma"])
        sh = jnp.zeros_like(p["bk_beta"])

    # fused input weight: [bn-folded numeric | sequential embeddings | static embeddings]
    w0 = jnp.concatenate([w_in_f, p["seq_tab"], p["emb_tab"]], axis=0)      # (Cin, R)
    blk_aff = jnp.concatenate([sc, sh], axis=1)                             # (NB, 2, R)

    w_even = jnp.concatenate([p["w_sig"][:, 0], p["w_gate"][:, 0]], axis=-1)  # (NB, R, 2G)
    w_odd = jnp.concatenate([p["w_sig"][:, 1], p["w_gate"][:, 1]], axis=-1)   # (NB, R, 2G)
    w_sg = jnp.concatenate([w_even, w_odd], axis=1)                           # (NB, 2R, 2G)

    # Fold the final 1x1 skip conv (applied to the length-1 last residual) into the last
    # block's skip conv: gated @ (Wsk + Wres @ Wfs) + (bsk + bres @ Wfs + bfs).
    w_skip = p["w_skip"].at[-1].set(p["w_skip"][-1] + p["w_res"][-1] @ p["w_fs"])
    b_skip = p["b_skip"].at[-1].set(p["b_skip"][-1] + p["b_res"][-1] @ p["w_fs"] + p["b_fs"])

    w_sr = jnp.concatenate([w_skip, p["w_res"]], axis=-1)                     # (NB, G, S+R)
    b_blk = jnp.concatenate(
        [p["b_sig"], p["b_gate"], b_skip, p["b_res"]], axis=-1)              # (NB, 1, 2G+S+R)

    w_head = jnp.concatenate([p["w_logit"], p["w_mean"], p["w_std"]], axis=-1)  # (H, 3M)
    b_head = jnp.concatenate([p["b_logit"], p["b_mean"], p["b_std"]], axis=-1)  # (1, 3M)
    b_misc = jnp.concatenate([b0, p["b_end"], b_head], axis=-1)                 # (1, R+H+3M)

    return (w0, blk_aff, w_sg, w_sr, b_blk, p["w_end"], w_head, b_misc)


def _one_hot_inputs(num_feat, emb_feat, emb_seq_feat):
    num_t = jnp.transpose(num_feat, (0, 2, 1)).astype(jnp.float32)            # (B, L, F)
    oh_emb = jnp.concatenate(
        [jax.nn.one_hot(emb_feat[:, n], v, dtype=jnp.float32) for n, v in enumerate(EMB_SIZE)],
        axis=-1)                                                              # (B, Ve)
    oh_seq = jnp.concatenate(
        [jax.nn.one_hot(emb_seq_feat[:, n], v, dtype=jnp.float32)
         for n, v in enumerate(EMB_SEQ_SIZE)],
        axis=-1)                                                              # (B, L, Vs)
    return num_t, oh_emb, oh_seq


@jax.jit
def wave_net_forward(params, num_feat, emb_feat, emb_seq_feat):
    """params: dict; num_feat (B,F,L) f32; emb_feat (B,n_emb) i32; emb_seq_feat (B,n_seq,L) i32."""
    B, _, L = num_feat.shape
    M = MIXTURE_SIZE

    num_t, oh_emb, oh_seq = _one_hot_inputs(num_feat, emb_feat, emb_seq_feat)
    oh_emb_b = jnp.broadcast_to(oh_emb[:, None, :], (B, L, oh_emb.shape[-1]))
    feats = jnp.concatenate([num_t, oh_seq, oh_emb_b], axis=-1)               # (B, L, Cin)
    cin = feats.shape[-1]

    # batch blocking: TB samples per grid step (pad batch; padded rows are discarded)
    TB = 256 if B >= 256 else _round_up(B, 8)
    b_pad = _round_up(B, TB)
    nb = b_pad // TB
    feats = jnp.pad(feats, ((0, b_pad - B), (0, 0), (0, 0)))
    # time-major / batch-minor rows per block: row (i, t, b) -> i*L*TB + t*TB + b
    x = feats.reshape(nb, TB, L, cin).transpose(0, 2, 1, 3).reshape(nb * L * TB, cin)

    packed = _pack_params(params)

    def full_spec(a):
        nd = a.ndim
        return pl.BlockSpec(a.shape, lambda i, _nd=nd: (0,) * _nd)

    out = pl.pallas_call(
        _wave_net_kernel,
        grid=(nb,),
        in_specs=[pl.BlockSpec((L * TB, cin), lambda i: (i, 0))]
                 + [full_spec(a) for a in packed],
        out_specs=pl.BlockSpec((TB, OUT_LANES), lambda i: (i, 0)),
        out_shape=jax.ShapeDtypeStruct((b_pad, OUT_LANES), jnp.float32),
        compiler_params=pltpu.CompilerParams(dimension_semantics=("parallel",)),
    )(x, *packed)

    logits = out[:B, :M].reshape(B, 1, M)
    loc = out[:B, M:2 * M].reshape(B, 1, M)
    scale = out[:B, 2 * M:3 * M].reshape(B, 1, M)
    return logits, loc, scale


# ----------------------------- pure-JAX reference (original, unfused math) -----------------------------
def reference_forward(params, num_feat, emb_feat, emb_seq_feat):
    B, _, L = num_feat.shape
    R = RESIDUAL_CHANNELS
    num_t, oh_emb, oh_seq = _one_hot_inputs(num_feat, emb_feat, emb_seq_feat)

    outs = []
    for b in range(B):
        x = num_t[b]
        if USE_BN:
            inv = jax.lax.rsqrt(params["in_rv"] + BN_EPS)
            x = (x - params["in_rm"]) * inv * params["in_gamma"] + params["in_beta"]
        y = x @ params["w_in"] + params["b_in"]
        y = y + oh_emb[b:b + 1] @ params["emb_tab"]           # broadcast over time
        y = y + oh_seq[b] @ params["seq_tab"]

        skips = jnp.zeros((1, SKIP_CHANNELS), jnp.float32)
        cur_len = L
        for blk in range(BLOCKS):
            z = y
            if USE_BN:
                invb = jax.lax.rsqrt(params["bk_rv"][blk] + BN_EPS)
                z = (z - params["bk_rm"][blk]) * invb * params["bk_gamma"][blk] + params["bk_beta"][blk]
            out_len = (cur_len + 1) // 2
            padded = jnp.concatenate([jnp.zeros((1, R), jnp.float32), z], axis=0)
            ze = padded[0:2 * out_len:2]                      # padded[2t]
            zo = padded[1:2 * out_len:2]                      # padded[2t+1]
            sig = jnp.tanh(ze @ params["w_sig"][blk, 0] + zo @ params["w_sig"][blk, 1]
                           + params["b_sig"][blk])
            gate = _sigmoid(ze @ params["w_gate"][blk, 0] + zo @ params["w_gate"][blk, 1]
                            + params["b_gate"][blk])
            gated = sig * gate
            skips = skips + gated[out_len - 1:out_len] @ params["w_skip"][blk] + params["b_skip"][blk]
            y = gated @ params["w_res"][blk] + params["b_res"][blk]
            cur_len = out_len

        skips = skips + y @ params["w_fs"] + params["b_fs"]
        h = jnp.maximum(skips, 0.0)
        h = jnp.maximum(h @ params["w_end"] + params["b_end"], 0.0)
        logits = h @ params["w_logit"] + params["b_logit"]
        loc = h @ params["w_mean"] + params["b_mean"]
        scale = _softplus(h @ params["w_std"] + params["b_std"]) + STD_EPS
        outs.append((logits, loc, scale))

    return (jnp.stack([o[0] for o in outs]),
            jnp.stack([o[1] for o in outs]),
            jnp.stack([o[2] for o in outs]))


# ----------------------------- deterministic parameter init -----------------------------
def init_params(key):
    keys = iter(jax.random.split(key, 64))

    def nrm(shape, scale=0.3):
        return (scale * jax.random.normal(next(keys), shape)).astype(jnp.float32)

    R, G, S, H, M, F = (RESIDUAL_CHANNELS, GATE_CHANNELS, SKIP_CHANNELS,
                        HEAD_CHANNELS, MIXTURE_SIZE, NUM_FEAT)
    NB = BLOCKS
    Ve = sum(EMB_SIZE)
    Vs = sum(EMB_SEQ_SIZE)

    return {
        "in_gamma": 1.0 + nrm((1, F), 0.1),
        "in_beta": nrm((1, F), 0.1),
        "in_rm": nrm((1, F), 0.1),
        "in_rv": 1.0 + jnp.abs(nrm((1, F), 0.1)),
        "w_in": nrm((F, R)),
        "b_in": nrm((1, R), 0.1),
        "emb_tab": nrm((Ve, R)),
        "seq_tab": nrm((Vs, R)),
        "bk_gamma": 1.0 + nrm((NB, 1, R), 0.1),
        "bk_beta": nrm((NB, 1, R), 0.1),
        "bk_rm": nrm((NB, 1, R), 0.1),
        "bk_rv": 1.0 + jnp.abs(nrm((NB, 1, R), 0.1)),
        "w_sig": nrm((NB, 2, R, G)),
        "b_sig": nrm((NB, 1, G), 0.1),
        "w_gate": nrm((NB, 2, R, G)),
        "b_gate": nrm((NB, 1, G), 0.1),
        "w_skip": nrm((NB, G, S)),
        "b_skip": nrm((NB, 1, S), 0.1),
        "w_res": nrm((NB, G, R)),
        "b_res": nrm((NB, 1, R), 0.1),
        "w_fs": nrm((R, S)),
        "b_fs": nrm((1, S), 0.1),
        "w_end": nrm((S, H)),
        "b_end": nrm((1, H), 0.1),
        "w_logit": nrm((H, M)),
        "b_logit": nrm((1, M), 0.1),
        "w_mean": nrm((H, M)),
        "b_mean": nrm((1, M), 0.1),
        "w_std": nrm((H, M)),
        "b_std": nrm((1, M), 0.1),
    }


# ----------------------------- main -----------------------------
if __name__ == "__main__":
    key = jax.random.PRNGKey(0)
    k_par, k_num, k_emb, k_seq = jax.random.split(key, 4)

    params = init_params(k_par)

    num_feat = jax.random.normal(k_num, (BATCH, NUM_FEAT, HISTORY_DAYS), dtype=jnp.float32)
    emb_feat = jnp.stack(
        [jax.random.randint(jax.random.fold_in(k_emb, n), (BATCH,), 0, v)
         for n, v in enumerate(EMB_SIZE)], axis=1).astype(jnp.int32)              # (B, n_emb)
    emb_seq_feat = jnp.stack(
        [jax.random.randint(jax.random.fold_in(k_seq, n), (BATCH, HISTORY_DAYS), 0, v)
         for n, v in enumerate(EMB_SEQ_SIZE)], axis=1).astype(jnp.int32)          # (B, n_seq, L)

    logits, loc, scale = wave_net_forward(params, num_feat, emb_feat, emb_seq_feat)
    jax.block_until_ready((logits, loc, scale))

    ref_logits, ref_loc, ref_scale = reference_forward(params, num_feat, emb_feat, emb_seq_feat)
    np.testing.assert_allclose(np.asarray(logits), np.asarray(ref_logits), rtol=2e-3, atol=2e-3)
    np.testing.assert_allclose(np.asarray(loc), np.asarray(ref_loc), rtol=2e-3, atol=2e-3)
    np.testing.assert_allclose(np.asarray(scale), np.asarray(ref_scale), rtol=2e-3, atol=2e-3)
    assert bool(jnp.all(scale > 0.0))

    print("KERNEL_OK")
</pallas_src>

<mosaic_0001>
module attributes {stable_mosaic.version = 11 : i64} {
  func.func @_wave_net_kernel(%arg0: i32, %arg1: memref<72x19xf32, #tpu.memory_space<vmem>>, %arg2: memref<19x8xf32, #tpu.memory_space<vmem>>, %arg3: memref<4x2x8xf32, #tpu.memory_space<vmem>>, %arg4: memref<4x16x16xf32, #tpu.memory_space<vmem>>, %arg5: memref<4x8x24xf32, #tpu.memory_space<vmem>>, %arg6: memref<4x1x40xf32, #tpu.memory_space<vmem>>, %arg7: memref<16x16xf32, #tpu.memory_space<vmem>>, %arg8: memref<16x12xf32, #tpu.memory_space<vmem>>, %arg9: memref<1x36xf32, #tpu.memory_space<vmem>>, %arg10: memref<8x128xf32, #tpu.memory_space<vmem>>) attributes {dimension_semantics = [#tpu.dimension_semantics<parallel>], iteration_bounds = array<i64: 1>, scalar_prefetch = 0 : i64, scratch_operands = 0 : i64, tpu.core_type = #tpu.core_type<tc>, window_params = [{transform_indices = @transform_0, window_bounds = array<i64: 72, 19>}, {pipeline_mode = #tpu.pipeline_mode<synchronous>, transform_indices = @transform_1, window_bounds = array<i64: 19, 8>}, {pipeline_mode = #tpu.pipeline_mode<synchronous>, transform_indices = @transform_2, window_bounds = array<i64: 4, 2, 8>}, {pipeline_mode = #tpu.pipeline_mode<synchronous>, transform_indices = @transform_3, window_bounds = array<i64: 4, 16, 16>}, {pipeline_mode = #tpu.pipeline_mode<synchronous>, transform_indices = @transform_4, window_bounds = array<i64: 4, 8, 24>}, {pipeline_mode = #tpu.pipeline_mode<synchronous>, transform_indices = @transform_5, window_bounds = array<i64: 4, 1, 40>}, {pipeline_mode = #tpu.pipeline_mode<synchronous>, transform_indices = @transform_6, window_bounds = array<i64: 16, 16>}, {pipeline_mode = #tpu.pipeline_mode<synchronous>, transform_indices = @transform_7, window_bounds = array<i64: 16, 12>}, {pipeline_mode = #tpu.pipeline_mode<synchronous>, transform_indices = @transform_8, window_bounds = array<i64: 1, 36>}, {transform_indices = @transform_9, window_bounds = array<i64: 8, 128>}]} {
    %c0 = arith.constant 0 : index
    %c0_0 = arith.constant 0 : index
    %0 = vector.load %arg9[%c0, %c0_0] : memref<1x36xf32, #tpu.memory_space<vmem>>, vector<1x36xf32>
    %1 = vector.extract_strided_slice %0 {offsets = [0, 0], sizes = [1, 8], strides = [1, 1]} : vector<1x36xf32> to vector<1x8xf32>
    %2 = vector.extract_strided_slice %0 {offsets = [0, 8], sizes = [1, 16], strides = [1, 1]} : vector<1x36xf32> to vector<1x16xf32>
    %3 = vector.extract_strided_slice %0 {offsets = [0, 24], sizes = [1, 12], strides = [1, 1]} : vector<1x36xf32> to vector<1x12xf32>
    %c0_1 = arith.constant 0 : index
    %c0_2 = arith.constant 0 : index
    %4 = vector.load %arg1[%c0_1, %c0_2] : memref<72x19xf32, #tpu.memory_space<vmem>>, vector<72x19xf32>
    %c0_3 = arith.constant 0 : index
    %c0_4 = arith.constant 0 : index
    %5 = vector.load %arg2[%c0_3, %c0_4] : memref<19x8xf32, #tpu.memory_space<vmem>>, vector<19x8xf32>
    %cst = arith.constant dense<0.000000e+00> : vector<72x8xf32>
    %6 = tpu.matmul %4, %5, %cst {dimension_numbers = #tpu.dot_dimension_numbers<[1], [0], [0], [1], [0, 0, 1, 1], [], []>} : vector<72x19xf32>, vector<19x8xf32>, vector<72x8xf32> -> vector<72x8xf32>
    %7 = vector.broadcast %1 : vector<1x8xf32> to vector<72x8xf32>
    %8 = arith.addf %6, %7 : vector<72x8xf32>
    %cst_5 = arith.constant 0.000000e+00 : f32
    %9 = vector.broadcast %cst_5 : f32 to vector<8x16xf32>
    %c0_6 = arith.constant 0 : index
    %c0_7 = arith.constant 0 : index
    %c0_8 = arith.constant 0 : index
    %10 = vector.load %arg3[%c0_6, %c0_7, %c0_8] : memref<4x2x8xf32, #tpu.memory_space<vmem>>, vector<1x2x8xf32>
    %11 = vector.shape_cast %10 : vector<1x2x8xf32> to vector<2x8xf32>
    %12 = vector.extract_strided_slice %11 {offsets = [0, 0], sizes = [1, 8], strides = [1, 1]} : vector<2x8xf32> to vector<1x8xf32>
    %13 = vector.broadcast %12 : vector<1x8xf32> to vector<72x8xf32>
    %14 = arith.mulf %8, %13 : vector<72x8xf32>
    %15 = vector.extract_strided_slice %11 {offsets = [1, 0], sizes = [1, 8], strides = [1, 1]} : vector<2x8xf32> to vector<1x8xf32>
    %16 = vector.broadcast %15 : vector<1x8xf32> to vector<72x8xf32>
    %17 = arith.addf %14, %16 : vector<72x8xf32>
    %18 = vector.extract_strided_slice %17 {offsets = [0, 0], sizes = [8, 8], strides = [1, 1]} : vector<72x8xf32> to vector<8x8xf32>
    %19 = vector.extract_strided_slice %17 {offsets = [16, 0], sizes = [8, 8], strides = [1, 1]} : vector<72x8xf32> to vector<8x8xf32>
    %20 = vector.extract_strided_slice %17 {offsets = [32, 0], sizes = [8, 8], strides = [1, 1]} : vector<72x8xf32> to vector<8x8xf32>
    %21 = vector.extract_strided_slice %17 {offsets = [48, 0], sizes = [8, 8], strides = [1, 1]} : vector<72x8xf32> to vector<8x8xf32>
    %22 = vector.extract_strided_slice %17 {offsets = [64, 0], sizes = [8, 8], strides = [1, 1]} : vector<72x8xf32> to vector<8x8xf32>
    %23 = tpu.concatenate %18, %19, %20, %21, %22 in 0 : vector<8x8xf32>, vector<8x8xf32>, vector<8x8xf32>, vector<8x8xf32>, vector<8x8xf32> -> vector<40x8xf32>
    %cst_9 = arith.constant 0.000000e+00 : f32
    %24 = vector.broadcast %cst_9 : f32 to vector<8x8xf32>
    %25 = vector.extract_strided_slice %17 {offsets = [8, 0], sizes = [8, 8], strides = [1, 1]} : vector<72x8xf32> to vector<8x8xf32>
    %26 = vector.extract_strided_slice %17 {offsets = [24, 0], sizes = [8, 8], strides = [1, 1]} : vector<72x8xf32> to vector<8x8xf32>
    %27 = vector.extract_strided_slice %17 {offsets = [40, 0], sizes = [8, 8], strides = [1, 1]} : vector<72x8xf32> to vector<8x8xf32>
    %28 = vector.extract_strided_slice %17 {offsets = [56, 0], sizes = [8, 8], strides = [1, 1]} : vector<72x8xf32> to vector<8x8xf32>
    %29 = tpu.concatenate %24, %25, %26, %27, %28 in 0 : vector<8x8xf32>, vector<8x8xf32>, vector<8x8xf32>, vector<8x8xf32>, vector<8x8xf32> -> vector<40x8xf32>
    %30 = tpu.concatenate %29, %23 in 1 : vector<40x8xf32>, vector<40x8xf32> -> vector<40x16xf32>
    %c0_10 = arith.constant 0 : index
    %c0_11 = arith.constant 0 : index
    %c0_12 = arith.constant 0 : index
    %31 = vector.load %arg6[%c0_10, %c0_11, %c0_12] : memref<4x1x40xf32, #tpu.memory_space<vmem>>, vector<1x1x40xf32>
    %32 = vector.shape_cast %31 : vector<1x1x40xf32> to vector<1x40xf32>
    %c0_13 = arith.constant 0 : index
    %c0_14 = arith.constant 0 : index
    %c0_15 = arith.constant 0 : index
    %33 = vector.load %arg4[%c0_13, %c0_14, %c0_15] : memref<4x16x16xf32, #tpu.memory_space<vmem>>, vector<1x16x16xf32>
    %34 = vector.shape_cast %33 : vector<1x16x16xf32> to vector<16x16xf32>
    %cst_16 = arith.constant dense<0.000000e+00> : vector<40x16xf32>
    %35 = tpu.matmul %30, %34, %cst_16 {dimension_numbers = #tpu.dot_dimension_numbers<[1], [0], [0], [1], [0, 0, 1, 1], [], []>} : vector<40x16xf32>, vector<16x16xf32>, vector<40x16xf32> -> vector<40x16xf32>
    %36 = vector.extract_strided_slice %32 {offsets = [0, 0], sizes = [1, 16], strides = [1, 1]} : vector<1x40xf32> to vector<1x16xf32>
    %37 = vector.broadcast %36 : vector<1x16xf32> to vector<40x16xf32>
    %38 = arith.addf %35, %37 : vector<40x16xf32>
    %39 = vector.extract_strided_slice %38 {offsets = [0, 0], sizes = [40, 8], strides = [1, 1]} : vector<40x16xf32> to vector<40x8xf32>
    %40 = math.tanh %39 : vector<40x8xf32>
    %41 = vector.extract_strided_slice %38 {offsets = [0, 8], sizes = [40, 8], strides = [1, 1]} : vector<40x16xf32> to vector<40x8xf32>
    %cst_17 = arith.constant 0.000000e+00 : f32
    %42 = vector.broadcast %cst_17 : f32 to vector<40x8xf32>
    %43 = arith.subf %42, %41 : vector<40x8xf32>
    %44 = math.exp %43 : vector<40x8xf32>
    %cst_18 = arith.constant 1.000000e+00 : f32
    %45 = vector.broadcast %cst_18 : f32 to vector<40x8xf32>
    %46 = arith.addf %45, %44 : vector<40x8xf32>
    %cst_19 = arith.constant 1.000000e+00 : f32
    %47 = vector.broadcast %cst_19 : f32 to vector<40x8xf32>
    %48 = arith.divf %47, %46 : vector<40x8xf32>
    %49 = arith.mulf %40, %48 : vector<40x8xf32>
    %c0_20 = arith.constant 0 : index
    %c0_21 = arith.constant 0 : index
    %c0_22 = arith.constant 0 : index
    %50 = vector.load %arg5[%c0_20, %c0_21, %c0_22] : memref<4x8x24xf32, #tpu.memory_space<vmem>>, vector<1x8x24xf32>
    %51 = vector.shape_cast %50 : vector<1x8x24xf32> to vector<8x24xf32>
    %cst_23 = arith.constant dense<0.000000e+00> : vector<40x24xf32>
    %52 = tpu.matmul %49, %51, %cst_23 {dimension_numbers = #tpu.dot_dimension_numbers<[1], [0], [0], [1], [0, 0, 1, 1], [], []>} : vector<40x8xf32>, vector<8x24xf32>, vector<40x24xf32> -> vector<40x24xf32>
    %53 = vector.extract_strided_slice %32 {offsets = [0, 16], sizes = [1, 24], strides = [1, 1]} : vector<1x40xf32> to vector<1x24xf32>
    %54 = vector.broadcast %53 : vector<1x24xf32> to vector<40x24xf32>
    %55 = arith.addf %52, %54 : vector<40x24xf32>
    %56 = vector.extract_strided_slice %55 {offsets = [32, 0], sizes = [8, 16], strides = [1, 1]} : vector<40x24xf32> to vector<8x16xf32>
    %57 = arith.addf %9, %56 : vector<8x16xf32>
    %58 = vector.extract_strided_slice %55 {offsets = [0, 16], sizes = [40, 8], strides = [1, 1]} : vector<40x24xf32> to vector<40x8xf32>
    %c1 = arith.constant 1 : index
    %c0_24 = arith.constant 0 : index
    %c0_25 = arith.constant 0 : index
    %59 = vector.load %arg3[%c1, %c0_24, %c0_25] : memref<4x2x8xf32, #tpu.memory_space<vmem>>, vector<1x2x8xf32>
    %60 = vector.shape_cast %59 : vector<1x2x8xf32> to vector<2x8xf32>
    %61 = vector.extract_strided_slice %60 {offsets = [0, 0], sizes = [1, 8], strides = [1, 1]} : vector<2x8xf32> to vector<1x8xf32>
    %62 = vector.broadcast %61 : vector<1x8xf32> to vector<40x8xf32>
    %63 = arith.mulf %58, %62 : vector<40x8xf32>
    %64 = vector.extract_strided_slice %60 {offsets = [1, 0], sizes = [1, 8], strides = [1, 1]} : vector<2x8xf32> to vector<1x8xf32>
    %65 = vector.broadcast %64 : vector<1x8xf32> to vector<40x8xf32>
    %66 = arith.addf %63, %65 : vector<40x8xf32>
    %67 = vector.extract_strided_slice %66 {offsets = [0, 0], sizes = [8, 8], strides = [1, 1]} : vector<40x8xf32> to vector<8x8xf32>
    %68 = vector.extract_strided_slice %66 {offsets = [16, 0], sizes = [8, 8], strides = [1, 1]} : vector<40x8xf32> to vector<8x8xf32>
    %69 = vector.extract_strided_slice %66 {offsets = [32, 0], sizes = [8, 8], strides = [1, 1]} : vector<40x8xf32> to vector<8x8xf32>
    %70 = tpu.concatenate %67, %68, %69 in 0 : vector<8x8xf32>, vector<8x8xf32>, vector<8x8xf32> -> vector<24x8xf32>
    %cst_26 = arith.constant 0.000000e+00 : f32
    %71 = vector.broadcast %cst_26 : f32 to vector<8x8xf32>
    %72 = vector.extract_strided_slice %66 {offsets = [8, 0], sizes = [8, 8], strides = [1, 1]} : vector<40x8xf32> to vector<8x8xf32>
    %73 = vector.extract_strided_slice %66 {offsets = [24, 0], sizes = [8, 8], strides = [1, 1]} : vector<40x8xf32> to vector<8x8xf32>
    %74 = tpu.concatenate %71, %72, %73 in 0 : vector<8x8xf32>, vector<8x8xf32>, vector<8x8xf32> -> vector<24x8xf32>
    %75 = tpu.concatenate %74, %70 in 1 : vector<24x8xf32>, vector<24x8xf32> -> vector<24x16xf32>
    %c1_27 = arith.constant 1 : index
    %c0_28 = arith.constant 0 : index
    %c0_29 = arith.constant 0 : index
    %76 = vector.load %arg6[%c1_27, %c0_28, %c0_29] : memref<4x1x40xf32, #tpu.memory_space<vmem>>, vector<1x1x40xf32>
    %77 = vector.shape_cast %76 : vector<1x1x40xf32> to vector<1x40xf32>
    %c1_30 = arith.constant 1 : index
    %c0_31 = arith.constant 0 : index
    %c0_32 = arith.constant 0 : index
    %78 = vector.load %arg4[%c1_30, %c0_31, %c0_32] : memref<4x16x16xf32, #tpu.memory_space<vmem>>, vector<1x16x16xf32>
    %79 = vector.shape_cast %78 : vector<1x16x16xf32> to vector<16x16xf32>
    %cst_33 = arith.constant dense<0.000000e+00> : vector<24x16xf32>
    %80 = tpu.matmul %75, %79, %cst_33 {dimension_numbers = #tpu.dot_dimension_numbers<[1], [0], [0], [1], [0, 0, 1, 1], [], []>} : vector<24x16xf32>, vector<16x16xf32>, vector<24x16xf32> -> vector<24x16xf32>
    %81 = vector.extract_strided_slice %77 {offsets = [0, 0], sizes = [1, 16], strides = [1, 1]} : vector<1x40xf32> to vector<1x16xf32>
    %82 = vector.broadcast %81 : vector<1x16xf32> to vector<24x16xf32>
    %83 = arith.addf %80, %82 : vector<24x16xf32>
    %84 = vector.extract_strided_slice %83 {offsets = [0, 0], sizes = [24, 8], strides = [1, 1]} : vector<24x16xf32> to vector<24x8xf32>
    %85 = math.tanh %84 : vector<24x8xf32>
    %86 = vector.extract_strided_slice %83 {offsets = [0, 8], sizes = [24, 8], strides = [1, 1]} : vector<24x16xf32> to vector<24x8xf32>
    %cst_34 = arith.constant 0.000000e+00 : f32
    %87 = vector.broadcast %cst_34 : f32 to vector<24x8xf32>
    %88 = arith.subf %87, %86 : vector<24x8xf32>
    %89 = math.exp %88 : vector<24x8xf32>
    %cst_35 = arith.constant 1.000000e+00 : f32
    %90 = vector.broadcast %cst_35 : f32 to vector<24x8xf32>
    %91 = arith.addf %90, %89 : vector<24x8xf32>
    %cst_36 = arith.constant 1.000000e+00 : f32
    %92 = vector.broadcast %cst_36 : f32 to vector<24x8xf32>
    %93 = arith.divf %92, %91 : vector<24x8xf32>
    %94 = arith.mulf %85, %93 : vector<24x8xf32>
    %c1_37 = arith.constant 1 : index
    %c0_38 = arith.constant 0 : index
    %c0_39 = arith.constant 0 : index
    %95 = vector.load %arg5[%c1_37, %c0_38, %c0_39] : memref<4x8x24xf32, #tpu.memory_space<vmem>>, vector<1x8x24xf32>
    %96 = vector.shape_cast %95 : vector<1x8x24xf32> to vector<8x24xf32>
    %cst_40 = arith.constant dense<0.000000e+00> : vector<24x24xf32>
    %97 = tpu.matmul %94, %96, %cst_40 {dimension_numbers = #tpu.dot_dimension_numbers<[1], [0], [0], [1], [0, 0, 1, 1], [], []>} : vector<24x8xf32>, vector<8x24xf32>, vector<24x24xf32> -> vector<24x24xf32>
    %98 = vector.extract_strided_slice %77 {offsets = [0, 16], sizes = [1, 24], strides = [1, 1]} : vector<1x40xf32> to vector<1x24xf32>
    %99 = vector.broadcast %98 : vector<1x24xf32> to vector<24x24xf32>
    %100 = arith.addf %97, %99 : vector<24x24xf32>
    %101 = vector.extract_strided_slice %100 {offsets = [16, 0], sizes = [8, 16], strides = [1, 1]} : vector<24x24xf32> to vector<8x16xf32>
    %102 = arith.addf %57, %101 : vector<8x16xf32>
    %103 = vector.extract_strided_slice %100 {offsets = [0, 16], sizes = [24, 8], strides = [1, 1]} : vector<24x24xf32> to vector<24x8xf32>
    %c2 = arith.constant 2 : index
    %c0_41 = arith.constant 0 : index
    %c0_42 = arith.constant 0 : index
    %104 = vector.load %arg3[%c2, %c0_41, %c0_42] : memref<4x2x8xf32, #tpu.memory_space<vmem>>, vector<1x2x8xf32>
    %105 = vector.shape_cast %104 : vector<1x2x8xf32> to vector<2x8xf32>
    %106 = vector.extract_strided_slice %105 {offsets = [0, 0], sizes = [1, 8], strides = [1, 1]} : vector<2x8xf32> to vector<1x8xf32>
    %107 = vector.broadcast %106 : vector<1x8xf32> to vector<24x8xf32>
    %108 = arith.mulf %103, %107 : vector<24x8xf32>
    %109 = vector.extract_strided_slice %105 {offsets = [1, 0], sizes = [1, 8], strides = [1, 1]} : vector<2x8xf32> to vector<1x8xf32>
    %110 = vector.broadcast %109 : vector<1x8xf32> to vector<24x8xf32>
    %111 = arith.addf %108, %110 : vector<24x8xf32>
    %112 = vector.extract_strided_slice %111 {offsets = [0, 0], sizes = [8, 8], strides = [1, 1]} : vector<24x8xf32> to vector<8x8xf32>
    %113 = vector.extract_strided_slice %111 {offsets = [16, 0], sizes = [8, 8], strides = [1, 1]} : vector<24x8xf32> to vector<8x8xf32>
    %114 = tpu.concatenate %112, %113 in 0 : vector<8x8xf32>, vector<8x8xf32> -> vector<16x8xf32>
    %cst_43 = arith.constant 0.000000e+00 : f32
    %115 = vector.broadcast %cst_43 : f32 to vector<8x8xf32>
    %116 = vector.extract_strided_slice %111 {offsets = [8, 0], sizes = [8, 8], strides = [1, 1]} : vector<24x8xf32> to vector<8x8xf32>
    %117 = tpu.concatenate %115, %116 in 0 : vector<8x8xf32>, vector<8x8xf32> -> vector<16x8xf32>
    %118 = tpu.concatenate %117, %114 in 1 : vector<16x8xf32>, vector<16x8xf32> -> vector<16x16xf32>
    %c2_44 = arith.constant 2 : index
    %c0_45 = arith.constant 0 : index
    %c0_46 = arith.constant 0 : index
    %119 = vector.load %arg6[%c2_44, %c0_45, %c0_46] : memref<4x1x40xf32, #tpu.memory_space<vmem>>, vector<1x1x40xf32>
    %120 = vector.shape_cast %119 : vector<1x1x40xf32> to vector<1x40xf32>
    %c2_47 = arith.constant 2 : index
    %c0_48 = arith.constant 0 : index
    %c0_49 = arith.constant 0 : index
    %121 = vector.load %arg4[%c2_47, %c0_48, %c0_49] : memref<4x16x16xf32, #tpu.memory_space<vmem>>, vector<1x16x16xf32>
    %122 = vector.shape_cast %121 : vector<1x16x16xf32> to vector<16x16xf32>
    %cst_50 = arith.constant dense<0.000000e+00> : vector<16x16xf32>
    %123 = tpu.matmul %118, %122, %cst_50 {dimension_numbers = #tpu.dot_dimension_numbers<[1], [0], [0], [1], [0, 0, 1, 1], [], []>} : vector<16x16xf32>, vector<16x16xf32>, vector<16x16xf32> -> vector<16x16xf32>
    %124 = vector.extract_strided_slice %120 {offsets = [0, 0], sizes = [1, 16], strides = [1, 1]} : vector<1x40xf32> to vector<1x16xf32>
    %125 = vector.broadcast %124 : vector<1x16xf32> to vector<16x16xf32>
    %126 = arith.addf %123, %125 : vector<16x16xf32>
    %127 = vector.extract_strided_slice %126 {offsets = [0, 0], sizes = [16, 8], strides = [1, 1]} : vector<16x16xf32> to vector<16x8xf32>
    %128 = math.tanh %127 : vector<16x8xf32>
    %129 = vector.extract_strided_slice %126 {offsets = [0, 8], sizes = [16, 8], strides = [1, 1]} : vector<16x16xf32> to vector<16x8xf32>
    %cst_51 = arith.constant 0.000000e+00 : f32
    %130 = vector.broadcast %cst_51 : f32 to vector<16x8xf32>
    %131 = arith.subf %130, %129 : vector<16x8xf32>
    %132 = math.exp %131 : vector<16x8xf32>
    %cst_52 = arith.constant 1.000000e+00 : f32
    %133 = vector.broadcast %cst_52 : f32 to vector<16x8xf32>
    %134 = arith.addf %133, %132 : vector<16x8xf32>
    %cst_53 = arith.constant 1.000000e+00 : f32
    %135 = vector.broadcast %cst_53 : f32 to vector<16x8xf32>
    %136 = arith.divf %135, %134 : vector<16x8xf32>
    %137 = arith.mulf %128, %136 : vector<16x8xf32>
    %c2_54 = arith.constant 2 : index
    %c0_55 = arith.constant 0 : index
    %c0_56 = arith.constant 0 : index
    %138 = vector.load %arg5[%c2_54, %c0_55, %c0_56] : memref<4x8x24xf32, #tpu.memory_space<vmem>>, vector<1x8x24xf32>
    %139 = vector.shape_cast %138 : vector<1x8x24xf32> to vector<8x24xf32>
    %cst_57 = arith.constant dense<0.000000e+00> : vector<16x24xf32>
    %140 = tpu.matmul %137, %139, %cst_57 {dimension_numbers = #tpu.dot_dimension_numbers<[1], [0], [0], [1], [0, 0, 1, 1], [], []>} : vector<16x8xf32>, vector<8x24xf32>, vector<16x24xf32> -> vector<16x24xf32>
    %141 = vector.extract_strided_slice %120 {offsets = [0, 16], sizes = [1, 24], strides = [1, 1]} : vector<1x40xf32> to vector<1x24xf32>
    %142 = vector.broadcast %141 : vector<1x24xf32> to vector<16x24xf32>
    %143 = arith.addf %140, %142 : vector<16x24xf32>
    %144 = vector.extract_strided_slice %143 {offsets = [8, 0], sizes = [8, 16], strides = [1, 1]} : vector<16x24xf32> to vector<8x16xf32>
    %145 = arith.addf %102, %144 : vector<8x16xf32>
    %146 = vector.extract_strided_slice %143 {offsets = [0, 16], sizes = [16, 8], strides = [1, 1]} : vector<16x24xf32> to vector<16x8xf32>
    %c3 = arith.constant 3 : index
    %c0_58 = arith.constant 0 : index
    %c0_59 = arith.constant 0 : index
    %147 = vector.load %arg3[%c3, %c0_58, %c0_59] : memref<4x2x8xf32, #tpu.memory_space<vmem>>, vector<1x2x8xf32>
    %148 = vector.shape_cast %147 : vector<1x2x8xf32> to vector<2x8xf32>
    %149 = vector.extract_strided_slice %148 {offsets = [0, 0], sizes = [1, 8], strides = [1, 1]} : vector<2x8xf32> to vector<1x8xf32>
    %150 = vector.broadcast %149 : vector<1x8xf32> to vector<16x8xf32>
    %151 = arith.mulf %146, %150 : vector<16x8xf32>
    %152 = vector.extract_strided_slice %148 {offsets = [1, 0], sizes = [1, 8], strides = [1, 1]} : vector<2x8xf32> to vector<1x8xf32>
    %153 = vector.broadcast %152 : vector<1x8xf32> to vector<16x8xf32>
    %154 = arith.addf %151, %153 : vector<16x8xf32>
    %155 = vector.extract_strided_slice %154 {offsets = [0, 0], sizes = [8, 8], strides = [1, 1]} : vector<16x8xf32> to vector<8x8xf32>
    %cst_60 = arith.constant 0.000000e+00 : f32
    %156 = vector.broadcast %cst_60 : f32 to vector<8x8xf32>
    %157 = tpu.concatenate %156, %155 in 1 : vector<8x8xf32>, vector<8x8xf32> -> vector<8x16xf32>
    %c3_61 = arith.constant 3 : index
    %c0_62 = arith.constant 0 : index
    %c0_63 = arith.constant 0 : index
    %158 = vector.load %arg6[%c3_61, %c0_62, %c0_63] : memref<4x1x40xf32, #tpu.memory_space<vmem>>, vector<1x1x40xf32>
    %159 = vector.shape_cast %158 : vector<1x1x40xf32> to vector<1x40xf32>
    %c3_64 = arith.constant 3 : index
    %c0_65 = arith.constant 0 : index
    %c0_66 = arith.constant 0 : index
    %160 = vector.load %arg4[%c3_64, %c0_65, %c0_66] : memref<4x16x16xf32, #tpu.memory_space<vmem>>, vector<1x16x16xf32>
    %161 = vector.shape_cast %160 : vector<1x16x16xf32> to vector<16x16xf32>
    %cst_67 = arith.constant dense<0.000000e+00> : vector<8x16xf32>
    %162 = tpu.matmul %157, %161, %cst_67 {dimension_numbers = #tpu.dot_dimension_numbers<[1], [0], [0], [1], [0, 0, 1, 1], [], []>} : vector<8x16xf32>, vector<16x16xf32>, vector<8x16xf32> -> vector<8x16xf32>
    %163 = vector.extract_strided_slice %159 {offsets = [0, 0], sizes = [1, 16], strides = [1, 1]} : vector<1x40xf32> to vector<1x16xf32>
    %164 = vector.broadcast %163 : vector<1x16xf32> to vector<8x16xf32>
    %165 = arith.addf %162, %164 : vector<8x16xf32>
    %166 = vector.extract_strided_slice %165 {offsets = [0, 0], sizes = [8, 8], strides = [1, 1]} : vector<8x16xf32> to vector<8x8xf32>
    %167 = math.tanh %166 : vector<8x8xf32>
    %168 = vector.extract_strided_slice %165 {offsets = [0, 8], sizes = [8, 8], strides = [1, 1]} : vector<8x16xf32> to vector<8x8xf32>
    %cst_68 = arith.constant 0.000000e+00 : f32
    %169 = vector.broadcast %cst_68 : f32 to vector<8x8xf32>
    %170 = arith.subf %169, %168 : vector<8x8xf32>
    %171 = math.exp %170 : vector<8x8xf32>
    %cst_69 = arith.constant 1.000000e+00 : f32
    %172 = vector.broadcast %cst_69 : f32 to vector<8x8xf32>
    %173 = arith.addf %172, %171 : vector<8x8xf32>
    %cst_70 = arith.constant 1.000000e+00 : f32
    %174 = vector.broadcast %cst_70 : f32 to vector<8x8xf32>
    %175 = arith.divf %174, %173 : vector<8x8xf32>
    %176 = arith.mulf %167, %175 : vector<8x8xf32>
    %c3_71 = arith.constant 3 : index
    %c0_72 = arith.constant 0 : index
    %c0_73 = arith.constant 0 : index
    %177 = vector.load %arg5[%c3_71, %c0_72, %c0_73] : memref<4x8x24xf32, #tpu.memory_space<vmem>>, vector<1x8x24xf32>
    %178 = vector.shape_cast %177 : vector<1x8x24xf32> to vector<8x24xf32>
    %cst_74 = arith.constant dense<0.000000e+00> : vector<8x24xf32>
    %179 = tpu.matmul %176, %178, %cst_74 {dimension_numbers = #tpu.dot_dimension_numbers<[1], [0], [0], [1], [0, 0, 1, 1], [], []>} : vector<8x8xf32>, vector<8x24xf32>, vector<8x24xf32> -> vector<8x24xf32>
    %180 = vector.extract_strided_slice %159 {offsets = [0, 16], sizes = [1, 24], strides = [1, 1]} : vector<1x40xf32> to vector<1x24xf32>
    %181 = vector.broadcast %180 : vector<1x24xf32> to vector<8x24xf32>
    %182 = arith.addf %179, %181 : vector<8x24xf32>
    %183 = vector.extract_strided_slice %182 {offsets = [0, 0], sizes = [8, 16], strides = [1, 1]} : vector<8x24xf32> to vector<8x16xf32>
    %184 = arith.addf %145, %183 : vector<8x16xf32>
    %cst_75 = arith.constant 0.000000e+00 : f32
    %185 = vector.broadcast %cst_75 : f32 to vector<8x16xf32>
    %186 = arith.maximumf %184, %185 : vector<8x16xf32>
    %c0_76 = arith.constant 0 : index
    %c0_77 = arith.constant 0 : index
    %187 = vector.load %arg7[%c0_76, %c0_77] : memref<16x16xf32, #tpu.memory_space<vmem>>, vector<16x16xf32>
    %cst_78 = arith.constant dense<0.000000e+00> : vector<8x16xf32>
    %188 = tpu.matmul %186, %187, %cst_78 {dimension_numbers = #tpu.dot_dimension_numbers<[1], [0], [0], [1], [0, 0, 1, 1], [], []>} : vector<8x16xf32>, vector<16x16xf32>, vector<8x16xf32> -> vector<8x16xf32>
    %189 = vector.broadcast %2 : vector<1x16xf32> to vector<8x16xf32>
    %190 = arith.addf %188, %189 : vector<8x16xf32>
    %cst_79 = arith.constant 0.000000e+00 : f32
    %191 = vector.broadcast %cst_79 : f32 to vector<8x16xf32>
    %192 = arith.maximumf %190, %191 : vector<8x16xf32>
    %c0_80 = arith.constant 0 : index
    %c0_81 = arith.constant 0 : index
    %193 = vector.load %arg8[%c0_80, %c0_81] : memref<16x12xf32, #tpu.memory_space<vmem>>, vector<16x12xf32>
    %cst_82 = arith.constant dense<0.000000e+00> : vector<8x12xf32>
    %194 = tpu.matmul %192, %193, %cst_82 {dimension_numbers = #tpu.dot_dimension_numbers<[1], [0], [0], [1], [0, 0, 1, 1], [], []>} : vector<8x16xf32>, vector<16x12xf32>, vector<8x12xf32> -> vector<8x12xf32>
    %195 = vector.broadcast %3 : vector<1x12xf32> to vector<8x12xf32>
    %196 = arith.addf %194, %195 : vector<8x12xf32>
    %197 = vector.extract_strided_slice %196 {offsets = [0, 8], sizes = [8, 4], strides = [1, 1]} : vector<8x12xf32> to vector<8x4xf32>
    %cst_83 = arith.constant 0.000000e+00 : f32
    %198 = vector.broadcast %cst_83 : f32 to vector<8x4xf32>
    %199 = arith.maximumf %197, %198 : vector<8x4xf32>
    %200 = math.absf %197 : vector<8x4xf32>
    %cst_84 = arith.constant 0.000000e+00 : f32
    %201 = vector.broadcast %cst_84 : f32 to vector<8x4xf32>
    %202 = arith.subf %201, %200 : vector<8x4xf32>
    %203 = math.exp %202 : vector<8x4xf32>
    %cst_85 = arith.constant 1.000000e+00 : f32
    %204 = vector.broadcast %cst_85 : f32 to vector<8x4xf32>
    %205 = arith.addf %204, %203 : vector<8x4xf32>
    %206 = math.log %205 : vector<8x4xf32>
    %207 = arith.addf %199, %206 : vector<8x4xf32>
    %cst_86 = arith.constant 9.99999997E-7 : f32
    %208 = vector.broadcast %cst_86 : f32 to vector<8x4xf32>
    %209 = arith.addf %207, %208 : vector<8x4xf32>
    %210 = vector.extract_strided_slice %196 {offsets = [0, 0], sizes = [8, 8], strides = [1, 1]} : vector<8x12xf32> to vector<8x8xf32>
    %cst_87 = arith.constant 0.000000e+00 : f32
    %211 = vector.broadcast %cst_87 : f32 to vector<8x116xf32>
    %212 = tpu.concatenate %210, %209, %211 in 1 : vector<8x8xf32>, vector<8x4xf32>, vector<8x116xf32> -> vector<8x128xf32>
    %c0_88 = arith.constant 0 : index
    %c0_89 = arith.constant 0 : index
    %213 = vector.load %arg10[%c0_88, %c0_89] : memref<8x128xf32, #tpu.memory_space<vmem>>, vector<8x128xf32>
    tpu.vector_store %arg10[%c0_88, %c0_89], %212 {strides = array<i32>} : memref<8x128xf32, #tpu.memory_space<vmem>>, vector<8x128xf32>,
    return
  }
  func.func @transform_0(%arg0: i32) -> (i32, i32) {
    %c0_i32 = arith.constant 0 : i32
    %c0_i32_0 = arith.constant 0 : i32
    return %arg0, %c0_i32 : i32, i32
  }
  func.func @transform_1(%arg0: i32) -> (i32, i32) {
    %c0_i32 = arith.constant 0 : i32
    %c0_i32_0 = arith.constant 0 : i32
    %c0_i32_1 = arith.constant 0 : i32
    return %c0_i32, %c0_i32_0 : i32, i32
  }
  func.func @transform_2(%arg0: i32) -> (i32, i32, i32) {
    %c0_i32 = arith.constant 0 : i32
    %c0_i32_0 = arith.constant 0 : i32
    %c0_i32_1 = arith.constant 0 : i32
    %c0_i32_2 = arith.constant 0 : i32
    return %c0_i32, %c0_i32_0, %c0_i32_1 : i32, i32, i32
  }
  func.func @transform_3(%arg0: i32) -> (i32, i32, i32) {
    %c0_i32 = arith.constant 0 : i32
    %c0_i32_0 = arith.constant 0 : i32
    %c0_i32_1 = arith.constant 0 : i32
    %c0_i32_2 = arith.constant 0 : i32
    return %c0_i32, %c0_i32_0, %c0_i32_1 : i32, i32, i32
  }
  func.func @transform_4(%arg0: i32) -> (i32, i32, i32) {
    %c0_i32 = arith.constant 0 : i32
    %c0_i32_0 = arith.constant 0 : i32
    %c0_i32_1 = arith.constant 0 : i32
    %c0_i32_2 = arith.constant 0 : i32
    return %c0_i32, %c0_i32_0, %c0_i32_1 : i32, i32, i32
  }
  func.func @transform_5(%arg0: i32) -> (i32, i32, i32) {
    %c0_i32 = arith.constant 0 : i32
    %c0_i32_0 = arith.constant 0 : i32
    %c0_i32_1 = arith.constant 0 : i32
    %c0_i32_2 = arith.constant 0 : i32
    return %c0_i32, %c0_i32_0, %c0_i32_1 : i32, i32, i32
  }
  func.func @transform_6(%arg0: i32) -> (i32, i32) {
    %c0_i32 = arith.constant 0 : i32
    %c0_i32_0 = arith.constant 0 : i32
    %c0_i32_1 = arith.constant 0 : i32
    return %c0_i32, %c0_i32_0 : i32, i32
  }
  func.func @transform_7(%arg0: i32) -> (i32, i32) {
    %c0_i32 = arith.constant 0 : i32
    %c0_i32_0 = arith.constant 0 : i32
    %c0_i32_1 = arith.constant 0 : i32
    return %c0_i32, %c0_i32_0 : i32, i32
  }
  func.func @transform_8(%arg0: i32) -> (i32, i32) {
    %c0_i32 = arith.constant 0 : i32
    %c0_i32_0 = arith.constant 0 : i32
    %c0_i32_1 = arith.constant 0 : i32
    return %c0_i32, %c0_i32_0 : i32, i32
  }
  func.func @transform_9(%arg0: i32) -> (i32, i32) {
    %c0_i32 = arith.constant 0 : i32
    %c0_i32_0 = arith.constant 0 : i32
    return %arg0, %c0_i32 : i32, i32
  }
}

</mosaic_0001>

<bundles_post_ra>
// kernel: wave_net_forward.1
= control target key start
LH: loop header
LB: loop body
LE: loop exit
PB: predicated region body
PF: predicated region fallthrough
CT: control target
= control target key end

     0   :  { %vm79_vm0 = vcmask 1042432   ;;  %v1744_v0 = vmov 0.0   ;;  %vm1745_vm1 = vmmov 0   ;;  %vm51_vm2 = vcmask 154624   ;;  %s1746_s17 = smov 8   ;;  %s1747_s21 = smov 120   ;;  %s2103_s1 = inlined_call_operand.vmem [shape: f32[19,8], index: 1, kind: input, shape index: {}]   ;;  %s2104_s0 = inlined_call_operand.vmem [shape: f32[72,19], index: 0, kind: input, shape index: {}]   ;;  %s2105_s3 = inlined_call_operand.vmem [shape: f32[4,16,16], index: 3, kind: input, shape index: {}]   ;;  %s2106_s2 = inlined_call_operand.vmem [shape: f32[4,2,8], index: 2, kind: input, shape index: {}]   ;;  %s2107_s8 = inlined_call_operand.vmem [shape: f32[1,36], index: 8, kind: input, shape index: {}]   ;;  %s2108_s4 = inlined_call_operand.vmem [shape: f32[4,8,24], index: 4, kind: input, shape index: {}]   ;;  %s2109_s5 = inlined_call_operand.vmem [shape: f32[4,1,40], index: 5, kind: input, shape index: {}]   ;;  %s2110_s6 = inlined_call_operand.vmem [shape: f32[16,16], index: 6, kind: input, shape index: {}]   ;;  %s2111_s7 = inlined_call_operand.vmem [shape: f32[16,12], index: 7, kind: input, shape index: {}]   ;;  %s2112_s9 = inlined_call_operand.vmem [shape: f32[8,128], index: 9, kind: output, shape index: {}]  }
   0x1   :  { %1536 = vmatprep.subr.mxu0 %v1744_v0  ;;  %v44_v1 = vld [vmem:[%s2103_s1 + $0x10] sm:$0x7]  ;;  %v43_v2 = vld [vmem:[%s2103_s1 + $0x8] sm:$0xff]  ;;  %1542 = vmatprep.mubr.msk.f32.mxu0 %vm1745_vm1, %v1744_v0  ;;  %v42_v3 = vld [vmem:[%s2103_s1] sm:$0xff]  ;;  %v194_v14 = vlaneseq  ;;  %vm240_vm3 = vcmask 64512   ;;  %vm255_vm4 = vcmask 130048  }
   0x2   :  { %1537 = vmatpush3.msk.msra.mxu0 %vm79_vm0, %v44_v1  ;;  %1569 = vmatprep.subr.mxu1 %v1744_v0  ;;  %v33_v4 = vld [vmem:[%s2104_s0] sm:$0xff]  ;;  %v34_v5 = vld [vmem:[%s2104_s0 + $0x8] sm:$0xff]  ;;  %v35_v6 = vld [vmem:[%s2104_s0 + $0x10] sm:$0xff]  ;;  %s1748_s24 = smov 112   ;;  %s1749_s25 = smov 16   ;;  %vm1423_vm5 = vcmask 97280  }
   0x3   :  { %1538 = vmatprep.subr.mxu0 %v1744_v0  ;;  %1573 = vmatprep.mubr.msk.f32.mxu1 %vm1745_vm1, %v1744_v0  ;;  %v36_v7 = vld [vmem:[%s2104_s0 + $0x18] sm:$0xff]  ;;  %v37_v8 = vld [vmem:[%s2104_s0 + $0x20] sm:$0xff]  ;;  %v38_v9 = vld [vmem:[%s2104_s0 + $0x28] sm:$0xff]  ;;  %v195_v15 = vshrl.u32 %v194_v14, 7 }
   0x4   :  { %1539 = vmatpush3.msra.mxu0 %v43_v2  ;;  %v39_v10 = vld [vmem:[%s2104_s0 + $0x30] sm:$0xff]  ;;  %v40_v11 = vld [vmem:[%s2104_s0 + $0x38] sm:$0xff]  ;;  %v41_v12 = vld [vmem:[%s2104_s0 + $0x40] sm:$0xff] }
   0x5   :  { %1540 = vmatprep.subr.mxu0 %v1744_v0  ;;  %v248_v13 = vld [vmem:[%s2105_s3 + $0x8] sm:$0xff]  ;;  %v247_v16 = vld [vmem:[%s2105_s3] sm:$0xff]  ;;  %v1880_v17 = vsub.s32 0, %v195_v15  ;;  %v1886_v19 = vsub.s32 1, %v195_v15 }
   0x6   :  { %1541 = vmatpush3.msra.mxu0 %v42_v3  ;;  %1570 = vmatpush3.msra.mxu1 %v248_v13  ;;  %v193_v18 = vld [vmem:[%s2106_s2] sm:$0x3] }
   0x7   :  { %1543 = vmatmul.mubr.msk.f32.vlgmr.msra.gmra.mxu0 %vm51_vm2, %v33_v4  ;;  %1605 = vmatprep.subr.mxu0 %v1744_v0  ;;  %v1891_v20 = vld [vmem:[%s2107_s8] ss:$0 sm:$0xff]  ;;  %v197_v21 = vrot.slane %v193_v18, %v1880_v17  ;;  %v210_v24 = vrot.slane %v193_v18, %v1886_v19 }
   0x8   :  { %1545 = vmatprep.mubr.msk.f32.mxu0 %vm1745_vm1, %v1744_v0  ;;  %1571 = vmatprep.subr.mxu1 %v1744_v0  ;;  %v421_v15 = vld [vmem:[%s2108_s4] sm:$0xff] }
   0x9   :  { %1572 = vmatpush3.msra.mxu1 %v247_v16  ;;  %v1441_v16 = vld [vmem:[%s2109_s5] ss:$0 sm:$0xff] }
   0xa   :  { %1588 = vmatprep.subr.mxu1 %v1744_v0 }
   0xb   :  { %1546 = vmatmul.mubr.msk.f32.gmra.mxu0 %vm51_vm2, %v34_v5 }
   0xc   :  { %1548 = vmatprep.mubr.msk.f32.mxu0 %vm1745_vm1, %v1744_v0 }
   0xf   :  { %1549 = vmatmul.mubr.msk.f32.gmra.mxu0 %vm51_vm2, %v35_v6 }
  0x10   :  { %1551 = vmatprep.mubr.msk.f32.mxu0 %vm1745_vm1, %v1744_v0 }
  0x13   :  { %1552 = vmatmul.mubr.msk.f32.gmra.mxu0 %vm51_vm2, %v36_v7 }
  0x14   :  { %1554 = vmatprep.mubr.msk.f32.mxu0 %vm1745_vm1, %v1744_v0 }
  0x17   :  { %1555 = vmatmul.mubr.msk.f32.gmra.mxu0 %vm51_vm2, %v37_v8 }
  0x18   :  { %1557 = vmatprep.mubr.msk.f32.mxu0 %vm1745_vm1, %v1744_v0 }
  0x1b   :  { %1558 = vmatmul.mubr.msk.f32.gmra.mxu0 %vm51_vm2, %v38_v9 }
  0x1c   :  { %1560 = vmatprep.mubr.msk.f32.mxu0 %vm1745_vm1, %v1744_v0 }
  0x1f   :  { %1561 = vmatmul.mubr.msk.f32.gmra.mxu0 %vm51_vm2, %v39_v10 }
  0x20   :  { %1563 = vmatprep.mubr.msk.f32.mxu0 %vm1745_vm1, %v1744_v0 }
  0x23   :  { %1564 = vmatmul.mubr.msk.f32.gmra.mxu0 %vm51_vm2, %v40_v11 }
  0x24   :  { %1566 = vmatprep.mubr.msk.f32.mxu0 %vm1745_vm1, %v1744_v0 }
  0x27   :  { %1567 = vmatmul.mubr.msk.f32.gmra.mxu0 %vm51_vm2, %v41_v12 }
  0x28   :  { %1609 = vmatprep.mubr.msk.f32.mxu0 %vm1745_vm1, %v1744_v0 }
  0xc7   :  { %v149_v22 = vpop.f32.mrf.mxu0 }
  0xc8   :  { %v150_v23 = vadd.f32 %v1891_v20, %v149_v22 }
  0xc9   :  { %v1544_v25 = vpop.f32.mrf.mxu0 }
  0xca   :  { %v198_v26 = vmul.f32 %v197_v21, %v150_v23 }
  0xcb   :  { %v154_v27 = vpop.f32.mrf.mxu0 }
  0xcc   :  { %v155_v28 = vadd.f32 %v1891_v20, %v154_v27  ;;  %v211_v29 = vadd.f32 %v210_v24, %v198_v26 }
  0xcd   :  { %v1547_v30 = vpop.f32.mrf.mxu0 }
  0xce   :  { %v199_v31 = vmul.f32 %v197_v21, %v155_v28  ;;  %225 = vrot.lane.b32.xlu0 %v211_v29, %s1746_s17 }
  0xcf   :  { %v159_v32 = vpop.f32.mrf.mxu0 }
  0xd0   :  { %v212_v33 = vadd.f32 %v210_v24, %v199_v31  ;;  %v160_v34 = vadd.f32 %v1891_v20, %v159_v32 }
  0xd1   :  { %v1550_v35 = vpop.f32.mrf.mxu0 }
  0xd2   :  { %v200_v36 = vmul.f32 %v197_v21, %v160_v34 }
  0xd3   :  { %v164_v37 = vpop.f32.mrf.mxu0 }
  0xd4   :  { %v165_v38 = vadd.f32 %v1891_v20, %v164_v37  ;;  %v213_v39 = vadd.f32 %v210_v24, %v200_v36 }
  0xd5   :  { %v1553_v40 = vpop.f32.mrf.mxu0 }
  0xd6   :  { %v201_v41 = vmul.f32 %v197_v21, %v165_v38  ;;  %227 = vrot.lane.b32.xlu0 %v213_v39, %s1746_s17 }
  0xd7   :  { %v169_v42 = vpop.f32.mrf.mxu0 }
  0xd8   :  { %v214_v43 = vadd.f32 %v210_v24, %v201_v41  ;;  %v170_v44 = vadd.f32 %v1891_v20, %v169_v42 }
  0xd9   :  { %v1556_v45 = vpop.f32.mrf.mxu0 }
  0xda   :  { %v202_v46 = vmul.f32 %v197_v21, %v170_v44 }
  0xdb   :  { %v174_v47 = vpop.f32.mrf.mxu0 }
  0xdc   :  { %v175_v48 = vadd.f32 %v1891_v20, %v174_v47  ;;  %v215_v49 = vadd.f32 %v210_v24, %v202_v46 }
  0xdd   :  { %v1559_v50 = vpop.f32.mrf.mxu0 }
  0xde   :  { %v203_v51 = vmul.f32 %v197_v21, %v175_v48  ;;  %229 = vrot.lane.b32.xlu1 %v215_v49, %s1746_s17 }
  0xdf   :  { %v179_v52 = vpop.f32.mrf.mxu0 }
  0xe0   :  { %v216_v53 = vadd.f32 %v210_v24, %v203_v51  ;;  %v180_v54 = vadd.f32 %v1891_v20, %v179_v52 }
  0xe1   :  { %v1562_v55 = vpop.f32.mrf.mxu0 }
  0xe2   :  { %v204_v56 = vmul.f32 %v197_v21, %v180_v54 }
  0xe3   :  { %v184_v57 = vpop.f32.mrf.mxu0 }
  0xe4   :  { %v185_v58 = vadd.f32 %v1891_v20, %v184_v57  ;;  %v217_v59 = vadd.f32 %v210_v24, %v204_v56 }
  0xe5   :  { %v1565_v60 = vpop.f32.mrf.mxu0 }
  0xe6   :  { %v205_v61 = vmul.f32 %v197_v21, %v185_v58  ;;  %231 = vrot.lane.b32.xlu1 %v217_v59, %s1746_s17  ;;  %v1452_v59 = vld [vmem:[%s2106_s2 + $0x2] sm:$0x3] }
  0xe7   :  { %v189_v62 = vpop.f32.mrf.mxu0  ;;  %v549_v60 = vrot.slane %v1452_v59, %v1886_v19 }
  0xe8   :  { %v218_v63 = vadd.f32 %v210_v24, %v205_v61  ;;  %v190_v1 = vadd.f32 %v1891_v20, %v189_v62  ;;  %v536_v62 = vrot.slane %v1452_v59, %v1880_v17 }
  0xe9   :  { %v1568_v2 = vpop.f32.mrf.mxu0 }
  0xea   :  { %v206_v3 = vmul.f32 %v197_v21, %v190_v1 }
  0xec   :  { %v219_v4 = vadd.f32 %v210_v24, %v206_v3 }
  0xee   :  { %233 = vrot.lane.b32.xlu0 %v219_v4, %s1746_s17 }
 0x140   :  { %v226_v5 = vpop.permute.xlu0 %225 }
 0x141   :  { %v241_v6 = vsel %vm240_vm3, 0.0, %v226_v5 }
 0x142   :  { %1574 = vmatmul.mubr.msk.f32.vlgmr.msra.gmra.mxu1 %vm255_vm4, %v241_v6 }
 0x143   :  { %1576 = vmatprep.mubr.msk.f32.mxu1 %vm1745_vm1, %v1744_v0  ;;  %1589 = vmatpush3.msra.mxu1 %v421_v15  ;;  %v1455_v15 = vld [vmem:[%s2105_s3 + $0x18] sm:$0xff] }
 0x144   :  { %1618 = vmatprep.subr.mxu1 %v1744_v0  ;;  %1606 = vmatpush3.msra.mxu0 %v1455_v15 }
 0x145   :  { %1607 = vmatprep.subr.mxu0 %v1744_v0 }
 0x148   :  { %v228_v7 = vpop.permute.xlu0 %227 }
 0x149   :  { %v242_v8 = vsel %vm240_vm3, %v212_v33, %v228_v7 }
 0x14a   :  { %1577 = vmatmul.mubr.msk.f32.gmra.mxu1 %vm255_vm4, %v242_v8 }
 0x14b   :  { %1579 = vmatprep.mubr.msk.f32.mxu1 %vm1745_vm1, %v1744_v0 }
 0x150   :  { %v230_v9 = vpop.permute.xlu1 %229 }
 0x151   :  { %v243_v10 = vsel %vm240_vm3, %v214_v43, %v230_v9 }
 0x152   :  { %1580 = vmatmul.mubr.msk.f32.gmra.mxu1 %vm255_vm4, %v243_v10 }
 0x153   :  { %1582 = vmatprep.mubr.msk.f32.mxu1 %vm1745_vm1, %v1744_v0 }
 0x158   :  { %v232_v11 = vpop.permute.xlu1 %231 }
 0x159   :  { %v244_v12 = vsel %vm240_vm3, %v216_v53, %v232_v11 }
 0x15a   :  { %1583 = vmatmul.mubr.msk.f32.gmra.mxu1 %vm255_vm4, %v244_v12 }
 0x15b   :  { %1585 = vmatprep.mubr.msk.f32.mxu1 %vm1745_vm1, %v1744_v0 }
 0x160   :  { %v234_v13 = vpop.permute.xlu0 %233 }
 0x161   :  { %v245_v14 = vsel %vm240_vm3, %v218_v63, %v234_v13 }
 0x162   :  { %1586 = vmatmul.mubr.msk.f32.gmra.mxu1 %vm255_vm4, %v245_v14 }
 0x163   :  { %1590 = vmatprep.mubr.msk.f32.mxu1 %vm1745_vm1, %v1744_v0 }
 0x202   :  { %v337_v18 = vpop.f32.mrf.mxu1 }
 0x203   :  { %v338_v21 = vadd.f32 %v1441_v16, %v337_v18 }
 0x204   :  { %v1575_v22 = vpop.f32.mrf.mxu1 }
 0x205   :  { %v366_v23 = vsub.f32 0.0, %v338_v21 }
 0x207   :  { %v371_v24 = vmul.f32 1.442695, %v366_v23 }
 0x209   :  { %1674 = vpow2.f32 %v371_v24 }
 0x20a   :  { %v342_v25 = vpop.f32.mrf.mxu1 }
 0x20b   :  { %v343_v26 = vadd.f32 %v1441_v16, %v342_v25 }
 0x20c   :  { %v1578_v27 = vpop.f32.mrf.mxu1 }
 0x20d   :  { %v367_v28 = vsub.f32 0.0, %v343_v26 }
 0x20f   :  { %v373_v29 = vmul.f32 1.442695, %v367_v28 }
 0x211   :  { %1676 = vpow2.f32 %v373_v29 }
 0x212   :  { %v347_v30 = vpop.f32.mrf.mxu1 }
 0x213   :  { %v348_v31 = vadd.f32 %v1441_v16, %v347_v30 }
 0x214   :  { %v1581_v32 = vpop.f32.mrf.mxu1 }
 0x215   :  { %v368_v33 = vsub.f32 0.0, %v348_v31 }
 0x216   :  { %v1675_v34 = vpop.eup %1674 }
 0x217   :  { %v381_v35 = vadd.f32 1.0, %v1675_v34  ;;  %v375_v36 = vmul.f32 1.442695, %v368_v33 }
 0x219   :  { %1678 = vrcp.f32 %v381_v35 }
 0x21a   :  { %1680 = vpow2.f32 %v375_v36  ;;  %v352_v37 = vpop.f32.mrf.mxu1 }
 0x21b   :  { %v353_v38 = vadd.f32 %v1441_v16, %v352_v37 }
 0x21c   :  { %v1584_v39 = vpop.f32.mrf.mxu1 }
 0x21d   :  { %v369_v40 = vsub.f32 0.0, %v353_v38 }
 0x21e   :  { %v1677_v41 = vpop.eup %1676 }
 0x21f   :  { %v382_v42 = vadd.f32 1.0, %v1677_v41  ;;  %v377_v43 = vmul.f32 1.442695, %v369_v40 }
 0x221   :  { %1682 = vrcp.f32 %v382_v42 }
 0x222   :  { %1684 = vpow2.f32 %v377_v43  ;;  %v357_v44 = vpop.f32.mrf.mxu1 }
 0x223   :  { %v358_v45 = vadd.f32 %v1441_v16, %v357_v44 }
 0x224   :  { %v1587_v46 = vpop.f32.mrf.mxu1 }
 0x225   :  { %v370_v47 = vsub.f32 0.0, %v358_v45 }
 0x226   :  { %v1679_v48 = vpop.eup %1678 }
 0x227   :  { %v1681_v49 = vpop.eup %1680  ;;  %v379_v50 = vmul.f32 1.442695, %v370_v47  ;;  %401 = vrot.lane.b32.xlu1 %v1679_v48, %s1747_s21 }
 0x228   :  { %v383_v51 = vadd.f32 1.0, %v1681_v49 }
 0x229   :  { %1686 = vpow2.f32 %v379_v50 }
 0x22a   :  { %1688 = vrcp.f32 %v383_v51 }
 0x22e   :  { %v1683_v52 = vpop.eup %1682 }
 0x22f   :  { %v1685_v53 = vpop.eup %1684  ;;  %403 = vrot.lane.b32.xlu0 %v1683_v52, %s1747_s21 }
 0x230   :  { %v384_v54 = vadd.f32 1.0, %v1685_v53 }
 0x232   :  { %1690 = vrcp.f32 %v384_v54 }
 0x236   :  { %v1687_v55 = vpop.eup %1686 }
 0x237   :  { %v1689_v56 = vpop.eup %1688  ;;  %v385_v57 = vadd.f32 1.0, %v1687_v55 }
 0x238   :  { %405 = vrot.lane.b32.xlu1 %v1689_v56, %s1747_s21  ;;  %v1456_v56 = vld [vmem:[%s2109_s5 + $0x1] ss:$0 sm:$0xff] }
 0x239   :  { %1692 = vrcp.f32 %v385_v57 }
 0x23a   :  { %1694 = vtanh.f32 %v338_v21 }
 0x23b   :  { %1696 = vtanh.f32 %v343_v26 }
 0x23c   :  { %1698 = vtanh.f32 %v348_v31 }
 0x23d   :  { %1700 = vtanh.f32 %v353_v38 }
 0x23e   :  { %1702 = vtanh.f32 %v358_v45 }
 0x23f   :  { %v1691_v58 = vpop.eup %1690 }
 0x240   :  { %407 = vrot.lane.b32.xlu0 %v1691_v58, %s1747_s21 }
 0x244   :  { %422 = vrot.lane.b32.xlu0 %v1441_v16, %s1748_s24  ;;  %v1454_v16 = vld [vmem:[%s2105_s3 + $0x10] sm:$0xff] }
 0x245   :  { %1608 = vmatpush3.msra.mxu0 %v1454_v16 }
 0x246   :  { %v1693_v61 = vpop.eup %1692 }
 0x247   :  { %409 = vrot.lane.b32.xlu1 %v1693_v61, %s1747_s21  ;;  %v1695_v63 = vpop.eup %1694 }
 0x248   :  { %551 = vrot.lane.b32.xlu0 %v549_v60, %s1749_s25  ;;  %v1697_v3 = vpop.eup %1696 }
 0x249   :  { %v1699_v6 = vpop.eup %1698 }
 0x24a   :  { %v1701_v9 = vpop.eup %1700 }
 0x24b   :  { %538 = vrot.lane.b32.xlu1 %v536_v62, %s1749_s25  ;;  %v1703_v12 = vpop.eup %1702 }
 0x299   :  { %v402_v1 = vpop.permute.xlu1 %401 }
 0x29a   :  { %v416_v2 = vmul.f32 %v1695_v63, %v402_v1 }
 0x29c   :  { %1591 = vmatmul.mubr.msk.f32.vlgmr.msra.gmra.mxu1 %vm240_vm3, %v416_v2 }
 0x29d   :  { %1593 = vmatprep.mubr.msk.f32.mxu1 %vm1745_vm1, %v1744_v0 }
 0x2a1   :  { %v404_v4 = vpop.permute.xlu0 %403 }
 0x2a2   :  { %v417_v5 = vmul.f32 %v1697_v3, %v404_v4 }
 0x2a4   :  { %1594 = vmatmul.mubr.msk.f32.gmra.mxu1 %vm240_vm3, %v417_v5 }
 0x2a5   :  { %1596 = vmatprep.mubr.msk.f32.mxu1 %vm1745_vm1, %v1744_v0 }
 0x2aa   :  { %v406_v7 = vpop.permute.xlu1 %405 }
 0x2ab   :  { %v418_v8 = vmul.f32 %v1699_v6, %v406_v7  ;;  %v1460_v6 = vld [vmem:[%s2108_s4 + $0x8] sm:$0xff] }
 0x2ac   :  { %1619 = vmatpush3.msra.mxu1 %v1460_v6 }
 0x2ad   :  { %1597 = vmatmul.mubr.msk.f32.gmra.mxu1 %vm240_vm3, %v418_v8 }
 0x2ae   :  { %1599 = vmatprep.mubr.msk.f32.mxu1 %vm1745_vm1, %v1744_v0 }
 0x2b2   :  { %v408_v10 = vpop.permute.xlu0 %407 }
 0x2b3   :  { %v419_v11 = vmul.f32 %v1701_v9, %v408_v10 }
 0x2b5   :  { %1600 = vmatmul.mubr.msk.f32.gmra.mxu1 %vm240_vm3, %v419_v11 }
 0x2b6   :  { %1602 = vmatprep.mubr.msk.f32.mxu1 %vm1745_vm1, %v1744_v0  ;;  %v423_v18 = vpop.permute.xlu0 %422 }
 0x2b9   :  { %v410_v13 = vpop.permute.xlu1 %409 }
 0x2ba   :  { %v420_v14 = vmul.f32 %v1703_v12, %v410_v13  ;;  %v552_v25 = vpop.permute.xlu0 %551 }
 0x2bc   :  { %1603 = vmatmul.mubr.msk.f32.gmra.mxu1 %vm240_vm3, %v420_v14 }
 0x2bd   :  { %1620 = vmatprep.mubr.msk.f32.mxu1 %vm1745_vm1, %v1744_v0  ;;  %v539_v22 = vpop.permute.xlu1 %538 }
 0x35c   :  { %v506_v21 = vpop.f32.mrf.mxu1 }
 0x35d   :  { %v507_v23 = vadd.f32 %v506_v21, %v423_v18  ;;  %v1464_v21 = vld [vmem:[%s2106_s2 + $0x4] sm:$0x3] }
 0x35e   :  { %v1592_v24 = vpop.f32.mrf.mxu1 }
 0x35f   :  { %v541_v26 = vmul.f32 %v539_v22, %v507_v23  ;;  %v818_v24 = vrot.slane %v1464_v21, %v1880_v17 }
 0x361   :  { %v554_v27 = vadd.f32 %v552_v25, %v541_v26 }
 0x363   :  { %570 = vrot.lane.b32.xlu1 %v554_v27, %s1747_s21 }
 0x364   :  { %v511_v28 = vpop.f32.mrf.mxu1 }
 0x365   :  { %v512_v29 = vadd.f32 %v511_v28, %v423_v18 }
 0x366   :  { %v1595_v30 = vpop.f32.mrf.mxu1 }
 0x367   :  { %v542_v31 = vmul.f32 %v539_v22, %v512_v29 }
 0x369   :  { %v555_v32 = vadd.f32 %v552_v25, %v542_v31 }
 0x36b   :  { %560 = vrot.lane.b32.xlu0 %v555_v32, %s1748_s24 }
 0x36d   :  { %v516_v33 = vpop.f32.mrf.mxu1 }
 0x36e   :  { %v517_v34 = vadd.f32 %v516_v33, %v423_v18 }
 0x36f   :  { %v1598_v35 = vpop.f32.mrf.mxu1 }
 0x370   :  { %v543_v36 = vmul.f32 %v539_v22, %v517_v34 }
 0x372   :  { %v556_v37 = vadd.f32 %v552_v25, %v543_v36 }
 0x374   :  { %572 = vrot.lane.b32.xlu1 %v556_v37, %s1747_s21 }
 0x375   :  { %v521_v38 = vpop.f32.mrf.mxu1 }
 0x376   :  { %v522_v39 = vadd.f32 %v521_v38, %v423_v18 }
 0x377   :  { %v1601_v40 = vpop.f32.mrf.mxu1 }
 0x378   :  { %v544_v41 = vmul.f32 %v539_v22, %v522_v39 }
 0x37a   :  { %v557_v42 = vadd.f32 %v552_v25, %v544_v41 }
 0x37c   :  { %564 = vrot.lane.b32.xlu0 %v557_v42, %s1748_s24  ;;  %v526_v43 = vpop.f32.mrf.mxu1  ;;  %v1467_v42 = vld [vmem:[%s2105_s3 + $0x28] sm:$0xff] }
 0x37d   :  { %v1975_v44 = vadd.f32 %v526_v43, %v423_v18  ;;  %v1466_v43 = vld [vmem:[%s2105_s3 + $0x20] sm:$0xff]  ;;  %1629 = vmatprep.subr.mxu0 %v1467_v42 }
 0x37e   :  { %v1604_v45 = vpop.f32.mrf.mxu1 }
 0x37f   :  { %v545_v46 = vmul.f32 %v539_v22, %v1975_v44  ;;  %v829_v22 = vrot.slane %v1464_v21, %v1886_v19 }
 0x381   :  { %v558_v47 = vadd.f32 %v552_v25, %v545_v46 }
 0x383   :  { %574 = vrot.lane.b32.xlu1 %v558_v47, %s1747_s21 }
 0x3d5   :  { %v571_v48 = vpop.permute.xlu1 %570 }
 0x3d6   :  { %v579_v49 = vsel %vm240_vm3, 0.0, %v571_v48 }
 0x3d7   :  { %1610 = vmatmul.mubr.msk.f32.vlgmr.msra.gmra.mxu0 %vm255_vm4, %v579_v49 }
 0x3d8   :  { %1612 = vmatprep.mubr.msk.f32.mxu0 %vm1745_vm1, %v1744_v0  ;;  %1630 = vmatpush3.msra.mxu0 %v1467_v42 }
 0x3d9   :  { %1631 = vmatprep.subr.mxu0 %v1466_v43 }
 0x3da   :  { %1632 = vmatpush3.msra.mxu0 %v1466_v43 }
 0x3db   :  { %1641 = vmatprep.subr.mxu0 %v1744_v0 }
 0x3dd   :  { %v561_v50 = vpop.permute.xlu0 %560 }
 0x3e6   :  { %v573_v51 = vpop.permute.xlu1 %572 }
 0x3e7   :  { %v580_v52 = vsel %vm240_vm3, %v561_v50, %v573_v51 }
 0x3e8   :  { %1613 = vmatmul.mubr.msk.f32.gmra.mxu0 %vm255_vm4, %v580_v52 }
 0x3e9   :  { %1615 = vmatprep.mubr.msk.f32.mxu0 %vm1745_vm1, %v1744_v0 }
 0x3ee   :  { %v565_v53 = vpop.permute.xlu0 %564 }
 0x3f5   :  { %v575_v54 = vpop.permute.xlu1 %574 }
 0x3f6   :  { %v581_v55 = vsel %vm240_vm3, %v565_v53, %v575_v54 }
 0x3f7   :  { %1616 = vmatmul.mubr.msk.f32.gmra.mxu0 %vm255_vm4, %v581_v55 }
 0x497   :  { %v668_v57 = vpop.f32.mrf.mxu0 }
 0x498   :  { %v669_v58 = vadd.f32 %v1456_v56, %v668_v57 }
 0x499   :  { %v1611_v59 = vpop.f32.mrf.mxu0 }
 0x49a   :  { %v685_v60 = vsub.f32 0.0, %v669_v58 }
 0x49c   :  { %v688_v61 = vmul.f32 1.442695, %v685_v60  ;;  %v1471_v60 = vld [vmem:[%s2108_s4 + $0x10] sm:$0xff] }
 0x49d   :  { %1636 = vmatprep.subr.mxu1 %v1471_v60 }
 0x49e   :  { %1704 = vpow2.f32 %v688_v61  ;;  %v1468_v61 = vld [vmem:[%s2109_s5 + $0x2] ss:$0 sm:$0xff] }
 0x4a8   :  { %v673_v62 = vpop.f32.mrf.mxu0 }
 0x4a9   :  { %v674_v63 = vadd.f32 %v1456_v56, %v673_v62 }
 0x4aa   :  { %v1614_v1 = vpop.f32.mrf.mxu0 }
 0x4ab   :  { %v1705_v2 = vpop.eup %1704  ;;  %v686_v3 = vsub.f32 0.0, %v674_v63 }
 0x4ac   :  { %v694_v4 = vadd.f32 1.0, %v1705_v2 }
 0x4ad   :  { %v690_v5 = vmul.f32 1.442695, %v686_v3 }
 0x4ae   :  { %1706 = vrcp.f32 %v694_v4 }
 0x4af   :  { %1708 = vpow2.f32 %v690_v5 }
 0x4b7   :  { %v678_v7 = vpop.f32.mrf.mxu0 }
 0x4b8   :  { %v679_v8 = vadd.f32 %v1456_v56, %v678_v7 }
 0x4b9   :  { %v1617_v9 = vpop.f32.mrf.mxu0 }
 0x4ba   :  { %v687_v10 = vsub.f32 0.0, %v679_v8 }
 0x4bb   :  { %v1707_v11 = vpop.eup %1706 }
 0x4bc   :  { %v1709_v12 = vpop.eup %1708  ;;  %v692_v13 = vmul.f32 1.442695, %v687_v10  ;;  %706 = vrot.lane.b32.xlu0 %v1707_v11, %s1747_s21  ;;  %v1474_v11 = vld [vmem:[%s2106_s2 + $0x6] sm:$0x3] }
 0x4bd   :  { %v695_v14 = vadd.f32 1.0, %v1709_v12 }
 0x4be   :  { %1710 = vpow2.f32 %v692_v13  ;;  %v1059_v13 = vrot.slane %v1474_v11, %v1880_v17  ;;  %v1477_v17 = vld [vmem:[%s2105_s3 + $0x38] sm:$0xff] }
 0x4bf   :  { %1712 = vrcp.f32 %v695_v14 }
 0x4cb   :  { %v1711_v15 = vpop.eup %1710 }
 0x4cc   :  { %v1713_v16 = vpop.eup %1712  ;;  %v696_v18 = vadd.f32 1.0, %v1711_v15  ;;  %v1068_v15 = vrot.slane %v1474_v11, %v1886_v19  ;;  %v1476_v19 = vld [vmem:[%s2105_s3 + $0x30] sm:$0xff] }
 0x4cd   :  { %708 = vrot.lane.b32.xlu1 %v1713_v16, %s1747_s21 }
 0x4ce   :  { %1714 = vrcp.f32 %v696_v18 }
 0x4cf   :  { %1716 = vtanh.f32 %v669_v58 }
 0x4d0   :  { %1718 = vtanh.f32 %v674_v63 }
 0x4d1   :  { %720 = vrot.lane.b32.xlu1 %v1456_v56, %s1748_s24  ;;  %1720 = vtanh.f32 %v679_v8 }
 0x4d5   :  { %831 = vrot.lane.b32.xlu1 %v829_v22, %s1749_s25 }
 0x4db   :  { %v1715_v23 = vpop.eup %1714 }
 0x4dc   :  { %710 = vrot.lane.b32.xlu0 %v1715_v23, %s1747_s21  ;;  %v1717_v25 = vpop.eup %1716 }
 0x4dd   :  { %v1719_v28 = vpop.eup %1718 }
 0x4de   :  { %v1721_v31 = vpop.eup %1720 }
 0x4e0   :  { %820 = vrot.lane.b32.xlu0 %v818_v24, %s1749_s25 }
 0x52e   :  { %v707_v26 = vpop.permute.xlu0 %706 }
 0x52f   :  { %v715_v27 = vmul.f32 %v1717_v25, %v707_v26 }
 0x531   :  { %1621 = vmatmul.mubr.msk.f32.vlgmr.msra.gmra.mxu1 %vm240_vm3, %v715_v27 }
 0x532   :  { %1623 = vmatprep.mubr.msk.f32.mxu1 %vm1745_vm1, %v1744_v0  ;;  %1637 = vmatpush3.msra.mxu1 %v1471_v60  ;;  %v1334_v60 = vld [vmem:[%s2111_s7] sm:$0xff] }
 0x533   :  { %1648 = vmatprep.subr.mxu1 %v1744_v0 }
 0x53f   :  { %v709_v29 = vpop.permute.xlu1 %708 }
 0x540   :  { %v716_v30 = vmul.f32 %v1719_v28, %v709_v29 }
 0x542   :  { %1624 = vmatmul.mubr.msk.f32.gmra.mxu1 %vm240_vm3, %v716_v30 }
 0x543   :  { %1626 = vmatprep.mubr.msk.f32.mxu1 %vm1745_vm1, %v1744_v0  ;;  %v721_v34 = vpop.permute.xlu1 %720 }
 0x547   :  { %v832_v39 = vpop.permute.xlu1 %831 }
 0x54e   :  { %v711_v32 = vpop.permute.xlu0 %710 }
 0x54f   :  { %v717_v33 = vmul.f32 %v1721_v31, %v711_v32 }
 0x551   :  { %1627 = vmatmul.mubr.msk.f32.gmra.mxu1 %vm240_vm3, %v717_v33 }
 0x552   :  { %v821_v36 = vpop.permute.xlu0 %820 }
 0x5f1   :  { %v798_v35 = vpop.f32.mrf.mxu1 }
 0x5f2   :  { %v799_v37 = vadd.f32 %v798_v35, %v721_v34 }
 0x5f3   :  { %v1622_v38 = vpop.f32.mrf.mxu1 }
 0x5f4   :  { %v823_v40 = vmul.f32 %v821_v36, %v799_v37 }
 0x5f6   :  { %v834_v41 = vadd.f32 %v832_v39, %v823_v40 }
 0x5f8   :  { %843 = vrot.lane.b32.xlu0 %v834_v41, %s1747_s21 }
 0x602   :  { %v803_v45 = vpop.f32.mrf.mxu1 }
 0x603   :  { %v804_v46 = vadd.f32 %v803_v45, %v721_v34 }
 0x604   :  { %v1625_v47 = vpop.f32.mrf.mxu1 }
 0x605   :  { %v824_v48 = vmul.f32 %v821_v36, %v804_v46 }
 0x607   :  { %v835_v49 = vadd.f32 %v832_v39, %v824_v48 }
 0x609   :  { %838 = vrot.lane.b32.xlu1 %v835_v49, %s1748_s24 }
 0x611   :  { %v808_v50 = vpop.f32.mrf.mxu1 }
 0x612   :  { %v2022_v51 = vadd.f32 %v808_v50, %v721_v34 }
 0x613   :  { %v1628_v52 = vpop.f32.mrf.mxu1 }
 0x614   :  { %v825_v53 = vmul.f32 %v821_v36, %v2022_v51  ;;  %v812_v27 = vadd.f32 %v2022_v51, %v1975_v44  ;;  %v1478_v36 = vld [vmem:[%s2109_s5 + $0x3] ss:$0 sm:$0xff]  ;;  %v1480_v44 = vld [vmem:[%s2108_s4 + $0x18] sm:$0xff]  ;;  %v1256_v51 = vld [vmem:[%s2110_s6 + $0x8] sm:$0xff] }
 0x615   :  { %v1255_v52 = vld [vmem:[%s2110_s6] sm:$0xff]  ;;  %s1750_s6 = smov 104  }
 0x616   :  { %v836_v54 = vadd.f32 %v832_v39, %v825_v53 }
 0x618   :  { %845 = vrot.lane.b32.xlu0 %v836_v54, %s1747_s21 }
 0x66a   :  { %v844_v55 = vpop.permute.xlu0 %843 }
 0x66b   :  { %v849_v56 = vsel %vm240_vm3, 0.0, %v844_v55 }
 0x66c   :  { %1633 = vmatprep.mubr.msk.f32.mxu0 %vm255_vm4, %v849_v56 }
 0x67b   :  { %v839_v57 = vpop.permute.xlu1 %838 }
 0x68a   :  { %v846_v58 = vpop.permute.xlu0 %845 }
 0x68b   :  { %v850_v59 = vsel %vm240_vm3, %v839_v57, %v846_v58 }
 0x68c   :  { %1634 = vmatmul.mubr.msk.f32.vlgmr.msra.gmra.mxu0 %vm255_vm4, %v850_v59  ;;  %v1335_v59 = vld [vmem:[%s2111_s7 + $0x8] sm:$0xff] }
 0x68d   :  { %1645 = vmatprep.mubr.msk.f32.mxu0 %vm1745_vm1, %v1744_v0  ;;  %1642 = vmatpush3.msra.mxu0 %v1477_v17 }
 0x68e   :  { %1643 = vmatprep.subr.mxu0 %v1744_v0 }
 0x68f   :  { %1644 = vmatpush3.msra.mxu0 %v1476_v19 }
 0x690   :  { %1653 = vmatprep.subr.mxu0 %v1744_v0 }
 0x74c   :  { %v1635_v62 = vpop.f32.mrf.mxu0 }
 0x74d   :  { %v940_v63 = vadd.f32 %v1635_v62, %v1468_v61 }
 0x74e   :  { %v934_v1 = vpop.f32.mrf.mxu0 }
 0x74f   :  { %v946_v2 = vsub.f32 0.0, %v940_v63  ;;  %v935_v3 = vadd.f32 %v1468_v61, %v934_v1 }
 0x751   :  { %v949_v4 = vmul.f32 1.442695, %v946_v2  ;;  %v945_v5 = vsub.f32 0.0, %v935_v3 }
 0x753   :  { %1722 = vpow2.f32 %v949_v4  ;;  %v947_v6 = vmul.f32 1.442695, %v945_v5 }
 0x755   :  { %1724 = vpow2.f32 %v947_v6 }
 0x760   :  { %v1723_v7 = vpop.eup %1722 }
 0x761   :  { %v952_v8 = vadd.f32 1.0, %v1723_v7 }
 0x762   :  { %v1725_v9 = vpop.eup %1724 }
 0x763   :  { %1726 = vrcp.f32 %v952_v8  ;;  %v951_v10 = vadd.f32 1.0, %v1725_v9 }
 0x765   :  { %1728 = vrcp.f32 %v951_v10 }
 0x766   :  { %1730 = vtanh.f32 %v935_v3 }
 0x767   :  { %1732 = vtanh.f32 %v940_v63 }
 0x770   :  { %v1727_v12 = vpop.eup %1726 }
 0x771   :  { %961 = vrot.lane.b32.xlu0 %v1727_v12, %s1747_s21 }
 0x772   :  { %v1729_v14 = vpop.eup %1728 }
 0x773   :  { %959 = vrot.lane.b32.xlu1 %v1729_v14, %s1747_s21  ;;  %v1731_v18 = vpop.eup %1730 }
 0x774   :  { %v1733_v22 = vpop.eup %1732 }
 0x775   :  { %1061 = vrot.lane.b32.xlu0 %v1059_v13, %s1749_s25 }
 0x777   :  { %969 = vrot.lane.b32.xlu1 %v1468_v61, %s1748_s24 }
 0x77b   :  { %1070 = vrot.lane.b32.xlu1 %v1068_v15, %s1749_s25 }
 0x7e3   :  { %v962_v16 = vpop.permute.xlu0 %961 }
 0x7e4   :  { %v966_v24 = vmul.f32 %v1733_v22, %v962_v16 }
 0x7e5   :  { %v960_v21 = vpop.permute.xlu1 %959 }
 0x7e6   :  { %v965_v23 = vmul.f32 %v1731_v18, %v960_v21 }
 0x7e7   :  { %v1062_v30 = vpop.permute.xlu0 %1061 }
 0x7e8   :  { %1638 = vmatprep.mubr.msk.f32.mxu1 %vm240_vm3, %v965_v23 }
 0x7e9   :  { %1639 = vmatmul.mubr.msk.f32.vlgmr.msra.gmra.mxu1 %vm240_vm3, %v966_v24  ;;  %v970_v25 = vpop.permute.xlu1 %969 }
 0x7ea   :  { %1650 = vmatprep.mubr.msk.f32.mxu1 %vm1745_vm1, %v1744_v0  ;;  %1649 = vmatpush3.msra.mxu1 %v1480_v44 }
 0x7eb   :  { %1660 = vmatprep.subr.mxu1 %v1744_v0 }
 0x7ed   :  { %v1071_v33 = vpop.permute.xlu1 %1070 }
 0x8a9   :  { %v1640_v26 = vpop.f32.mrf.mxu1 }
 0x8aa   :  { %v1050_v28 = vadd.f32 %v1640_v26, %v970_v25 }
 0x8ab   :  { %v1044_v29 = vpop.f32.mrf.mxu1 }
 0x8ac   :  { %v1053_v31 = vadd.f32 %v1050_v28, %v812_v27  ;;  %v1045_v32 = vadd.f32 %v1044_v29, %v970_v25 }
 0x8ae   :  { %v1064_v34 = vmul.f32 %v1062_v30, %v1045_v32 }
 0x8b0   :  { %v1073_v35 = vadd.f32 %v1071_v33, %v1064_v34 }
 0x8b2   :  { %1075 = vrot.lane.b32.xlu0 %v1073_v35, %s1747_s21 }
 0x8b6   :  { %1177 = vrot.lane.b32.xlu0 %v1478_v36, %s1748_s24 }
 0x8ba   :  { %1336 = vrot.lane.b32.xlu0 %v1891_v20, %s1750_s6 }
 0x924   :  { %v1076_v37 = vpop.permute.xlu0 %1075 }
 0x925   :  { %v1078_v38 = vsel %vm240_vm3, 0.0, %v1076_v37 }
 0x926   :  { %1646 = vmatmul.mubr.msk.f32.vlgmr.msra.gmra.mxu0 %vm255_vm4, %v1078_v38 }
 0x927   :  { %1657 = vmatprep.mubr.msk.f32.mxu0 %vm1745_vm1, %v1744_v0  ;;  %1654 = vmatpush3.msra.mxu0 %v1256_v51 }
 0x928   :  { %1655 = vmatprep.subr.mxu0 %v1744_v0  ;;  %v1178_v53 = vpop.permute.xlu0 %1177 }
 0x929   :  { %1656 = vmatpush3.msra.mxu0 %v1255_v52 }
 0x92c   :  { %v1337_v3 = vpop.permute.xlu0 %1336 }
 0x9e6   :  { %v1159_v39 = vpop.f32.mrf.mxu0 }
 0x9e7   :  { %v1160_v40 = vadd.f32 %v1478_v36, %v1159_v39 }
 0x9e8   :  { %v1647_v41 = vpop.f32.mrf.mxu0 }
 0x9e9   :  { %v1164_v42 = vsub.f32 0.0, %v1160_v40 }
 0x9eb   :  { %v1165_v43 = vmul.f32 1.442695, %v1164_v42 }
 0x9ed   :  { %1734 = vpow2.f32 %v1165_v43 }
 0x9fa   :  { %v1735_v45 = vpop.eup %1734 }
 0x9fb   :  { %v1167_v46 = vadd.f32 1.0, %v1735_v45 }
 0x9fd   :  { %1736 = vrcp.f32 %v1167_v46 }
 0x9fe   :  { %1738 = vtanh.f32 %v1160_v40 }
 0xa0a   :  { %v1737_v47 = vpop.eup %1736 }
 0xa0b   :  { %1171 = vrot.lane.b32.xlu1 %v1737_v47, %s1747_s21  ;;  %v1739_v48 = vpop.eup %1738 }
 0xa0f   :  { %1257 = vrot.lane.b32.xlu1 %v1891_v20, %s1747_s21 }
 0xa7d   :  { %v1172_v49 = vpop.permute.xlu1 %1171 }
 0xa7e   :  { %v1174_v50 = vmul.f32 %v1739_v48, %v1172_v49 }
 0xa80   :  { %1651 = vmatmul.mubr.msk.f32.vlgmr.msra.gmra.mxu1 %vm240_vm3, %v1174_v50 }
 0xa81   :  { %1664 = vmatprep.mubr.msk.f32.mxu1 %vm1745_vm1, %v1744_v0  ;;  %1661 = vmatpush3.msra.mxu1 %v1335_v59  ;;  %v1258_v61 = vpop.permute.xlu1 %1257 }
 0xa82   :  { %1662 = vmatprep.subr.mxu1 %v1744_v0 }
 0xa83   :  { %1663 = vmatpush3.msra.mxu1 %v1334_v60 }
 0xb40   :  { %v1249_v54 = vpop.f32.mrf.mxu1 }
 0xb41   :  { %v1250_v55 = vadd.f32 %v1249_v54, %v1178_v53 }
 0xb42   :  { %v1652_v56 = vpop.f32.mrf.mxu1 }
 0xb43   :  { %v1253_v57 = vadd.f32 %v1250_v55, %v1053_v31 }
 0xb45   :  { %v1254_v58 = vmax.f32 %v1253_v57, 0.0 }
 0xb47   :  { %1658 = vmatmul.mubr.msk.f32.vlgmr.msra.gmra.mxu0 %vm255_vm4, %v1254_v58 }
 0xc07   :  { %v1329_v62 = vpop.f32.mrf.mxu0 }
 0xc08   :  { %v1330_v63 = vadd.f32 %v1329_v62, %v1258_v61 }
 0xc09   :  { %v1659_v1 = vpop.f32.mrf.mxu0 }
 0xc0a   :  { %v1333_v2 = vmax.f32 %v1330_v63, 0.0 }
 0xc0c   :  { %1665 = vmatmul.mubr.msk.f32.vlgmr.msra.gmra.mxu1 %vm255_vm4, %v1333_v2 }
 0xccc   :  { %v1408_v4 = vpop.f32.mrf.mxu1 }
 0xccd   :  { %v1409_v5 = vadd.f32 %v1408_v4, %v1337_v3 }
 0xcce   :  { %v1666_v6 = vpop.f32.mrf.mxu1 }
 0xccf   :  { %v1413_v7 = vand.u32 2147483647, %v1409_v5  ;;  %v1412_v20 = vmax.f32 %v1409_v5, 0.0 }
 0xcd1   :  { %v1414_v8 = vsub.f32 0.0, %v1413_v7 }
 0xcd3   :  { %v1415_v9 = vmul.f32 1.442695, %v1414_v8 }
 0xcd5   :  { %1740 = vpow2.f32 %v1415_v9 }
 0xce2   :  { %v1741_v0 = vpop.eup %1740 }
 0xce3   :  { %v1417_v10 = vadd.f32 1.0, %v1741_v0 }
 0xce5   :  { %1742 = vlog2.f32 %v1417_v10 }
 0xcf2   :  { %v1743_v11 = vpop.eup %1742 }
 0xcf3   :  { %v1419_v12 = vmul.f32 0.6931472, %v1743_v11 }
 0xcf5   :  { %v1420_v13 = vadd.f32 %v1419_v12, %v1412_v20 }
 0xcf7   :  { %v1421_v14 = vadd.f32 1e-06, %v1420_v13 }
 0xcf9   :  { %v1422_v15 = vsel %vm240_vm3, %v1409_v5, %v1421_v14 }
 0xcfa   :  { %v1424_v16 = vsel %vm1423_vm5, %v1422_v15, 0.0 }
 0xcfb   :  { %1425 = vst [vmem:[%s2112_s9] sm:$0xff] %v1424_v16 }

</bundles_post_ra>
